<compile_context>
chip_gen: v7x
topology: tpu7x:2x2x1
jax: 0.10.0
libtpu: 0.0.40
codegen_flags: <defaults>
</compile_context>

<pallas_src>
import functools
import math

import jax
import jax.numpy as jnp
from jax.experimental import pallas as pl
from jax.experimental.pallas import tpu as pltpu


# --------------------------------------------------------------- fused kernel (grid over L)

def _bert_classifier_kernel(
    x_ref, bias_ref, emb_g_ref, emb_b_ref,
    wqkv_ref, bqkv_ref, wo_ref, bo_ref, ln1g_ref, ln1b_ref,
    w1_ref, b1_ref, w2_ref, b2_ref, ln2g_ref, ln2b_ref,
    poolw_ref, poolb_ref, clsw_ref, clsb_ref,
    out_ref, x_scr, *, B, S, NH, DH, L, scale):
  """One encoder layer per grid step; activations resident in VMEM scratch x_scr."""
  H = NH * DH
  BS = B * S
  l = pl.program_id(0)

  def layernorm(v, g, b):
    mu = jnp.mean(v, axis=-1, keepdims=True)
    c = v - mu
    var = jnp.mean(c * c, axis=-1, keepdims=True)
    return c * jax.lax.rsqrt(var + 1e-12) * g + b

  def gelu(y):
    # TODO(synk): HF BERT default is exact erf-GELU; tanh approximation kept for Mosaic-safe
    # lowering (small numerical difference vs. the PyTorch reference).
    c = math.sqrt(2.0 / math.pi)
    return 0.5 * y * (1.0 + jnp.tanh(c * (y + 0.044715 * y * y * y)))

  # Embedding LayerNorm -> seed the resident activation slab (first grid step only).
  @pl.when(l == 0)
  def _():
    x_scr[...] = layernorm(x_ref[...], emb_g_ref[...], emb_b_ref[...])

  x = x_scr[...]                                    # [B*S, H] f32 (elementwise math stays f32)
  x16 = x.astype(jnp.bfloat16)                      # MXU operand (f32 accumulation below)

  # ---- attention: all B*NH heads in one block-diagonal matmul pair -------------------------
  # Per-head QKV weight stacking makes q/k/v land head-major on the sublane axis:
  #   row  h*B*S + b*S + s  <=>  (head h, batch b, token s)   -> [NH*B*S, 3*DH]
  qkv = jnp.concatenate(
      [jnp.dot(x16, wqkv_ref[h], preferred_element_type=jnp.float32) + bqkv_ref[h]
       for h in range(NH)],
      axis=0)                                       # sublane-tile-aligned concat (BS % 8 == 0)
  q = qkv[:, :DH]
  k = qkv[:, DH:2 * DH]
  v = qkv[:, 2 * DH:3 * DH]

  # One score matmul for all heads; bias_ref carries the block-diagonal structure plus the
  # key-padding bias, so no per-head masking / bias broadcasts.  Contraction on dim 1 of both
  # operands keeps k.T out of the source (any residual RHS relayout is one small op per layer).
  s = jax.lax.dot_general(
      q.astype(jnp.bfloat16), k.astype(jnp.bfloat16), (((1,), (1,)), ((), ())),
      preferred_element_type=jnp.float32) * scale + bias_ref[...]
  s = s - jnp.max(s, axis=-1, keepdims=True)
  e = jnp.exp(s)
  p = e * pl.reciprocal(jnp.sum(e, axis=-1, keepdims=True), approx=True)   # EUP slot
  ctx = jnp.dot(p.astype(jnp.bfloat16), v.astype(jnp.bfloat16),
                preferred_element_type=jnp.float32)                        # [NH*B*S, DH]

  # Head fold-back fused into the output projection: attn = sum_h ctx_h @ Wo[h*DH:(h+1)*DH, :]
  attn = bo_ref[...]
  for h in range(NH):
    attn = attn + jnp.dot(ctx[h * BS:(h + 1) * BS, :].astype(jnp.bfloat16), wo_ref[h],
                          preferred_element_type=jnp.float32)
  x = layernorm(attn + x, ln1g_ref[...], ln1b_ref[...])

  # ---- feed-forward -------------------------------------------------------------------------
  ff = gelu(jnp.dot(x.astype(jnp.bfloat16), w1_ref[...],
                    preferred_element_type=jnp.float32) + b1_ref[...])
  ff = jnp.dot(ff.astype(jnp.bfloat16), w2_ref[...],
               preferred_element_type=jnp.float32) + b2_ref[...]
  x = layernorm(ff + x, ln2g_ref[...], ln2b_ref[...])
  x_scr[...] = x

  # ---- pooler + classifier epilogue (last grid step only) ------------------------------------
  @pl.when(l == L - 1)
  def _():
    cls = x_scr[pl.ds(0, B, stride=S), :]           # CLS rows via one strided sublane read [B,H]
    pooled = jnp.tanh(
        jnp.dot(cls, poolw_ref[...], preferred_element_type=jnp.float32) + poolb_ref[...])
    # dropout(p=0.5) is identity at inference.
    # TODO(synk): training-mode stochastic dropout via pltpu.prng_seed / prng_random_bits.
    logits = jnp.dot(pooled, clsw_ref[...], preferred_element_type=jnp.float32) + clsb_ref[...]
    out_ref[...] = (1.0 / (1.0 + jnp.exp(-logits))).astype(out_ref.dtype)  # exact sigmoid


# --------------------------------------------------------------------- model / param prep

CFG = dict(vocab=100, type_vocab=2, max_pos=16, hidden=32, heads=2, dh=16,
           ffn=64, layers=2, nclasses=6)

_NC_PAD = 128  # pad classifier output to a full 128-lane vreg width (lane-dense store)


def init_params(key, cfg):
  def nrm(k, shape):
    return jax.random.normal(k, shape, jnp.float32) * 0.02

  H, F = cfg["hidden"], cfg["ffn"]
  keys = iter(jax.random.split(key, 64))
  p = {
      "word_emb": nrm(next(keys), (cfg["vocab"], H)),
      "pos_emb": nrm(next(keys), (cfg["max_pos"], H)),
      "type_emb": nrm(next(keys), (cfg["type_vocab"], H)),
      "emb_ln_g": jnp.ones((H,), jnp.float32),
      "emb_ln_b": jnp.zeros((H,), jnp.float32),
      "pool_w": nrm(next(keys), (H, H)),
      "pool_b": jnp.zeros((H,), jnp.float32),
      "cls_w": nrm(next(keys), (H, cfg["nclasses"])),
      "cls_b": jnp.zeros((cfg["nclasses"],), jnp.float32),
      "layers": [],
  }
  for _ in range(cfg["layers"]):
    p["layers"].append({
        "wq": nrm(next(keys), (H, H)), "bq": jnp.zeros((H,), jnp.float32),
        "wk": nrm(next(keys), (H, H)), "bk": jnp.zeros((H,), jnp.float32),
        "wv": nrm(next(keys), (H, H)), "bv": jnp.zeros((H,), jnp.float32),
        "wo": nrm(next(keys), (H, H)), "bo": jnp.zeros((H,), jnp.float32),
        "ln1_g": jnp.ones((H,), jnp.float32), "ln1_b": jnp.zeros((H,), jnp.float32),
        "w1": nrm(next(keys), (H, F)), "b1": jnp.zeros((F,), jnp.float32),
        "w2": nrm(next(keys), (F, H)), "b2": jnp.zeros((H,), jnp.float32),
        "ln2_g": jnp.ones((H,), jnp.float32), "ln2_b": jnp.zeros((H,), jnp.float32),
    })
  return p


def prepare_params(params, cfg):
  """One-time kernel-ready weight prep: per-head stacking, bf16 MXU cast, lane padding."""
  H, NH, DH, NC = cfg["hidden"], cfg["heads"], cfg["dh"], cfg["nclasses"]
  L = cfg["layers"]
  layers = params["layers"]

  def head_cols(w):  # [H, H] -> [NH, H, DH]  (per-head column split)
    return jnp.stack([w[:, h * DH:(h + 1) * DH] for h in range(NH)])

  def head_vec(b):   # [H] -> [NH, 1, DH]
    return jnp.stack([b[h * DH:(h + 1) * DH][None, :] for h in range(NH)])

  wqkv = jnp.stack([jnp.concatenate(
      [head_cols(l["wq"]), head_cols(l["wk"]), head_cols(l["wv"])], axis=2) for l in layers])
  bqkv = jnp.stack([jnp.concatenate(
      [head_vec(l["bq"]), head_vec(l["bk"]), head_vec(l["bv"])], axis=2) for l in layers])

  stack2 = lambda n: jnp.stack([l[n] for l in layers])
  stack1 = lambda n: jnp.stack([l[n][None, :] for l in layers])

  return {
      "word_emb": params["word_emb"], "pos_emb": params["pos_emb"],
      "type_emb": params["type_emb"],
      "emb_ln_g": params["emb_ln_g"].reshape(1, H),
      "emb_ln_b": params["emb_ln_b"].reshape(1, H),
      "wqkv": wqkv.astype(jnp.bfloat16),                                    # [L, NH, H, 3*DH]
      "bqkv": bqkv.astype(jnp.float32),                                     # [L, NH, 1, 3*DH]
      "wo": stack2("wo").reshape(L, NH, DH, H).astype(jnp.bfloat16),        # [L, NH, DH, H]
      "bo": stack1("bo"),                                                   # [L, 1, H]
      "ln1_g": stack1("ln1_g"), "ln1_b": stack1("ln1_b"),
      "w1": stack2("w1").astype(jnp.bfloat16), "b1": stack1("b1"),          # [L, H, F], [L, 1, F]
      "w2": stack2("w2").astype(jnp.bfloat16), "b2": stack1("b2"),          # [L, F, H], [L, 1, H]
      "ln2_g": stack1("ln2_g"), "ln2_b": stack1("ln2_b"),
      "pool_w": params["pool_w"], "pool_b": params["pool_b"].reshape(1, H),
      "cls_w": jnp.zeros((H, _NC_PAD), jnp.float32).at[:, :NC].set(params["cls_w"]),
      "cls_b": jnp.zeros((1, _NC_PAD), jnp.float32).at[:, :NC].set(params["cls_b"][None, :]),
  }


# ------------------------------------------------------------------------------ forward

def bert_classifier_forward(prep, input_ids, mask, cfg):
  B, S = input_ids.shape
  H, NH, DH = cfg["hidden"], cfg["heads"], cfg["dh"]
  F, L, NC = cfg["ffn"], cfg["layers"], cfg["nclasses"]
  M = NH * B * S

  # Embedding gathers (XLA glue); token_type_ids == 0.  LayerNorm happens inside the kernel.
  x = (prep["word_emb"][input_ids]
       + prep["pos_emb"][jnp.arange(S)][None, :, :]
       + prep["type_emb"][0][None, None, :])
  x2 = x.reshape(B * S, H).astype(jnp.float32)

  # Block-diagonal attention bias in head-major (h, b) block order:
  #   off-block -> -1e9 (different head/batch), in-block -> HF extended-mask key-padding bias.
  key_pad = (1.0 - mask.astype(jnp.float32)) * -10000.0        # [B, S]
  key_pad = jnp.tile(key_pad, (NH, 1)).reshape(M)              # (h, b, s) column order
  blk = jnp.arange(M) // S
  attn_bias = jnp.where(blk[:, None] == blk[None, :], key_pad[None, :], -1e9)

  inputs = (
      x2, attn_bias, prep["emb_ln_g"], prep["emb_ln_b"],
      prep["wqkv"], prep["bqkv"], prep["wo"], prep["bo"],
      prep["ln1_g"], prep["ln1_b"], prep["w1"], prep["b1"],
      prep["w2"], prep["b2"], prep["ln2_g"], prep["ln2_b"],
      prep["pool_w"], prep["pool_b"], prep["cls_w"], prep["cls_b"],
  )

  def const_spec(shape):          # fetched once (constant block index across the layer grid)
    return pl.BlockSpec(shape, lambda l, n=len(shape): (0,) * n)

  def layer_spec(shape):          # streamed per layer, leading L dim squeezed out
    return pl.BlockSpec((None,) + shape, lambda l, n=len(shape): (l,) + (0,) * n)

  in_specs = [
      const_spec((B * S, H)),                         # embeddings
      const_spec((M, M)),                             # block-diag attention bias
      const_spec((1, H)), const_spec((1, H)),         # embedding LN
      layer_spec((NH, H, 3 * DH)),                    # fused per-head QKV weights
      layer_spec((NH, 1, 3 * DH)),                    # fused per-head QKV biases
      layer_spec((NH, DH, H)),                        # per-head output projection
      layer_spec((1, H)),                             # bo
      layer_spec((1, H)), layer_spec((1, H)),         # ln1 g/b
      layer_spec((H, F)), layer_spec((1, F)),         # w1, b1
      layer_spec((F, H)), layer_spec((1, H)),         # w2, b2
      layer_spec((1, H)), layer_spec((1, H)),         # ln2 g/b
      const_spec((H, H)), const_spec((1, H)),         # pooler
      const_spec((H, _NC_PAD)), const_spec((1, _NC_PAD)),  # classifier (lane-padded)
  ]

  out = pl.pallas_call(
      functools.partial(_bert_classifier_kernel,
                        B=B, S=S, NH=NH, DH=DH, L=L, scale=1.0 / math.sqrt(DH)),
      out_shape=jax.ShapeDtypeStruct((B, _NC_PAD), jnp.float32),
      grid=(L,),
      in_specs=in_specs,
      out_specs=pl.BlockSpec((B, _NC_PAD), lambda l: (0, 0)),
      scratch_shapes=[pltpu.VMEM((B * S, H), jnp.float32)],   # resident activation slab
      compiler_params=pltpu.CompilerParams(dimension_semantics=("arbitrary",)),
  )(*inputs)
  # TODO(synk): on v7x, add a leading "parallel" batch grid axis to feed both TensorCores.

  return out[:, :NC]                                           # [B, nclasses]


# ----------------------------------------------------------------------------------- main

if __name__ == "__main__":
  key = jax.random.PRNGKey(0)
  k_param, k_ids = jax.random.split(key)

  B, S = 2, 8
  params = init_params(k_param, CFG)
  prepped = prepare_params(params, CFG)        # one-time weight prep (hoisted out of forward)
  input_ids = jax.random.randint(k_ids, (B, S), 0, CFG["vocab"], dtype=jnp.int32)
  mask = jnp.ones((B, S), jnp.int32).at[1, 6:].set(0)   # pad last 2 tokens of row 1

  out = bert_classifier_forward(prepped, input_ids, mask, CFG)
  out = jax.block_until_ready(out)

  assert out.shape == (B, CFG["nclasses"])
  assert bool(jnp.all((out >= 0.0) & (out <= 1.0)))
  print("KERNEL_OK")
</pallas_src>

<mosaic_0001>
module attributes {stable_mosaic.version = 11 : i64} {
  func.func @_bert_classifier_kernel(%arg0: i32, %arg1: memref<16x32xf32, #tpu.memory_space<vmem>>, %arg2: memref<32x32xf32, #tpu.memory_space<vmem>>, %arg3: memref<1x32xf32, #tpu.memory_space<vmem>>, %arg4: memref<1x32xf32, #tpu.memory_space<vmem>>, %arg5: memref<1x2x32x48xbf16, #tpu.memory_space<vmem>>, %arg6: memref<1x2x1x48xf32, #tpu.memory_space<vmem>>, %arg7: memref<1x2x16x32xbf16, #tpu.memory_space<vmem>>, %arg8: memref<1x1x32xf32, #tpu.memory_space<vmem>>, %arg9: memref<1x1x32xf32, #tpu.memory_space<vmem>>, %arg10: memref<1x1x32xf32, #tpu.memory_space<vmem>>, %arg11: memref<1x32x64xbf16, #tpu.memory_space<vmem>>, %arg12: memref<1x1x64xf32, #tpu.memory_space<vmem>>, %arg13: memref<1x64x32xbf16, #tpu.memory_space<vmem>>, %arg14: memref<1x1x32xf32, #tpu.memory_space<vmem>>, %arg15: memref<1x1x32xf32, #tpu.memory_space<vmem>>, %arg16: memref<1x1x32xf32, #tpu.memory_space<vmem>>, %arg17: memref<32x32xf32, #tpu.memory_space<vmem>>, %arg18: memref<1x32xf32, #tpu.memory_space<vmem>>, %arg19: memref<32x128xf32, #tpu.memory_space<vmem>>, %arg20: memref<1x128xf32, #tpu.memory_space<vmem>>, %arg21: memref<2x128xf32, #tpu.memory_space<vmem>>, %arg22: memref<16x32xf32, #tpu.memory_space<vmem>>) attributes {dimension_semantics = [#tpu.dimension_semantics<arbitrary>], iteration_bounds = array<i64: 2>, scalar_prefetch = 0 : i64, scratch_operands = 1 : i64, tpu.core_type = #tpu.core_type<tc>, window_params = [{pipeline_mode = #tpu.pipeline_mode<synchronous>, transform_indices = @transform_0, window_bounds = array<i64: 16, 32>}, {pipeline_mode = #tpu.pipeline_mode<synchronous>, transform_indices = @transform_1, window_bounds = array<i64: 32, 32>}, {pipeline_mode = #tpu.pipeline_mode<synchronous>, transform_indices = @transform_2, window_bounds = array<i64: 1, 32>}, {pipeline_mode = #tpu.pipeline_mode<synchronous>, transform_indices = @transform_3, window_bounds = array<i64: 1, 32>}, {transform_indices = @transform_4, window_bounds = array<i64: 1, 2, 32, 48>}, {transform_indices = @transform_5, window_bounds = array<i64: 1, 2, 1, 48>}, {transform_indices = @transform_6, window_bounds = array<i64: 1, 2, 16, 32>}, {transform_indices = @transform_7, window_bounds = array<i64: 1, 1, 32>}, {transform_indices = @transform_8, window_bounds = array<i64: 1, 1, 32>}, {transform_indices = @transform_9, window_bounds = array<i64: 1, 1, 32>}, {transform_indices = @transform_10, window_bounds = array<i64: 1, 32, 64>}, {transform_indices = @transform_11, window_bounds = array<i64: 1, 1, 64>}, {transform_indices = @transform_12, window_bounds = array<i64: 1, 64, 32>}, {transform_indices = @transform_13, window_bounds = array<i64: 1, 1, 32>}, {transform_indices = @transform_14, window_bounds = array<i64: 1, 1, 32>}, {transform_indices = @transform_15, window_bounds = array<i64: 1, 1, 32>}, {pipeline_mode = #tpu.pipeline_mode<synchronous>, transform_indices = @transform_16, window_bounds = array<i64: 32, 32>}, {pipeline_mode = #tpu.pipeline_mode<synchronous>, transform_indices = @transform_17, window_bounds = array<i64: 1, 32>}, {pipeline_mode = #tpu.pipeline_mode<synchronous>, transform_indices = @transform_18, window_bounds = array<i64: 32, 128>}, {pipeline_mode = #tpu.pipeline_mode<synchronous>, transform_indices = @transform_19, window_bounds = array<i64: 1, 128>}, {pipeline_mode = #tpu.pipeline_mode<synchronous>, transform_indices = @transform_20, window_bounds = array<i64: 2, 128>}]} {
    %c0_i32 = arith.constant 0 : i32
    %0 = arith.cmpi eq, %arg0, %c0_i32 : i32
    %1 = arith.extui %0 : i1 to i32
    %c0_i32_0 = arith.constant 0 : i32
    %2 = arith.cmpi ne, %1, %c0_i32_0 : i32
    scf.if %2 {
      %c0_81 = arith.constant 0 : index
      %c0_82 = arith.constant 0 : index
      %141 = vector.load %arg1[%c0_81, %c0_82] : memref<16x32xf32, #tpu.memory_space<vmem>>, vector<16x32xf32>
      %c0_83 = arith.constant 0 : index
      %c0_84 = arith.constant 0 : index
      %142 = vector.load %arg3[%c0_83, %c0_84] : memref<1x32xf32, #tpu.memory_space<vmem>>, vector<1x32xf32>
      %c0_85 = arith.constant 0 : index
      %c0_86 = arith.constant 0 : index
      %143 = vector.load %arg4[%c0_85, %c0_86] : memref<1x32xf32, #tpu.memory_space<vmem>>, vector<1x32xf32>
      %cst_87 = arith.constant dense<0.000000e+00> : vector<16xf32>
      %144 = vector.multi_reduction <add>, %141, %cst_87 [1] : vector<16x32xf32> to vector<16xf32>
      %145 = vector.shape_cast %144 : vector<16xf32> to vector<16x1xf32>
      %cst_88 = arith.constant 3.200000e+01 : f32
      %146 = vector.broadcast %cst_88 : f32 to vector<16x1xf32>
      %147 = arith.divf %145, %146 : vector<16x1xf32>
      %148 = vector.broadcast %147 : vector<16x1xf32> to vector<16x32xf32>
      %149 = arith.subf %141, %148 : vector<16x32xf32>
      %150 = arith.mulf %149, %149 : vector<16x32xf32>
      %cst_89 = arith.constant dense<0.000000e+00> : vector<16xf32>
      %151 = vector.multi_reduction <add>, %150, %cst_89 [1] : vector<16x32xf32> to vector<16xf32>
      %152 = vector.shape_cast %151 : vector<16xf32> to vector<16x1xf32>
      %cst_90 = arith.constant 3.200000e+01 : f32
      %153 = vector.broadcast %cst_90 : f32 to vector<16x1xf32>
      %154 = arith.divf %152, %153 : vector<16x1xf32>
      %cst_91 = arith.constant 9.99999996E-13 : f32
      %155 = vector.broadcast %cst_91 : f32 to vector<16x1xf32>
      %156 = arith.addf %154, %155 : vector<16x1xf32>
      %157 = math.rsqrt %156 : vector<16x1xf32>
      %158 = vector.broadcast %157 : vector<16x1xf32> to vector<16x32xf32>
      %159 = arith.mulf %149, %158 : vector<16x32xf32>
      %160 = vector.broadcast %142 : vector<1x32xf32> to vector<16x32xf32>
      %161 = arith.mulf %159, %160 : vector<16x32xf32>
      %162 = vector.broadcast %143 : vector<1x32xf32> to vector<16x32xf32>
      %163 = arith.addf %161, %162 : vector<16x32xf32>
      %c0_92 = arith.constant 0 : index
      %c0_93 = arith.constant 0 : index
      %164 = vector.load %arg22[%c0_92, %c0_93] : memref<16x32xf32, #tpu.memory_space<vmem>>, vector<16x32xf32>
      tpu.vector_store %arg22[%c0_92, %c0_93], %163 {strides = array<i32>} : memref<16x32xf32, #tpu.memory_space<vmem>>, vector<16x32xf32>,
    } else {
    }
    %c0 = arith.constant 0 : index
    %c0_1 = arith.constant 0 : index
    %3 = vector.load %arg22[%c0, %c0_1] : memref<16x32xf32, #tpu.memory_space<vmem>>, vector<16x32xf32>
    %4 = arith.truncf %3 : vector<16x32xf32> to vector<16x32xbf16>
    %c0_2 = arith.constant 0 : index
    %c0_3 = arith.constant 0 : index
    %c0_4 = arith.constant 0 : index
    %c0_5 = arith.constant 0 : index
    %5 = vector.load %arg5[%c0_2, %c0_3, %c0_4, %c0_5] : memref<1x2x32x48xbf16, #tpu.memory_space<vmem>>, vector<1x1x32x48xbf16>
    %6 = vector.shape_cast %5 : vector<1x1x32x48xbf16> to vector<32x48xbf16>
    %cst = arith.constant dense<0.000000e+00> : vector<16x48xf32>
    %7 = tpu.matmul %4, %6, %cst {dimension_numbers = #tpu.dot_dimension_numbers<[1], [0], [0], [1], [0, 0, 1, 1], [], []>} : vector<16x32xbf16>, vector<32x48xbf16>, vector<16x48xf32> -> vector<16x48xf32>
    %c0_6 = arith.constant 0 : index
    %c0_7 = arith.constant 0 : index
    %c0_8 = arith.constant 0 : index
    %c0_9 = arith.constant 0 : index
    %8 = vector.load %arg6[%c0_6, %c0_7, %c0_8, %c0_9] : memref<1x2x1x48xf32, #tpu.memory_space<vmem>>, vector<1x1x1x48xf32>
    %9 = vector.shape_cast %8 : vector<1x1x1x48xf32> to vector<1x48xf32>
    %10 = vector.broadcast %9 : vector<1x48xf32> to vector<16x48xf32>
    %11 = arith.addf %7, %10 : vector<16x48xf32>
    %c0_10 = arith.constant 0 : index
    %c1 = arith.constant 1 : index
    %c0_11 = arith.constant 0 : index
    %c0_12 = arith.constant 0 : index
    %12 = vector.load %arg5[%c0_10, %c1, %c0_11, %c0_12] : memref<1x2x32x48xbf16, #tpu.memory_space<vmem>>, vector<1x1x32x48xbf16>
    %13 = vector.shape_cast %12 : vector<1x1x32x48xbf16> to vector<32x48xbf16>
    %cst_13 = arith.constant dense<0.000000e+00> : vector<16x48xf32>
    %14 = tpu.matmul %4, %13, %cst_13 {dimension_numbers = #tpu.dot_dimension_numbers<[1], [0], [0], [1], [0, 0, 1, 1], [], []>} : vector<16x32xbf16>, vector<32x48xbf16>, vector<16x48xf32> -> vector<16x48xf32>
    %c0_14 = arith.constant 0 : index
    %c1_15 = arith.constant 1 : index
    %c0_16 = arith.constant 0 : index
    %c0_17 = arith.constant 0 : index
    %15 = vector.load %arg6[%c0_14, %c1_15, %c0_16, %c0_17] : memref<1x2x1x48xf32, #tpu.memory_space<vmem>>, vector<1x1x1x48xf32>
    %16 = vector.shape_cast %15 : vector<1x1x1x48xf32> to vector<1x48xf32>
    %17 = vector.broadcast %16 : vector<1x48xf32> to vector<16x48xf32>
    %18 = arith.addf %14, %17 : vector<16x48xf32>
    %19 = tpu.concatenate %11, %18 in 0 : vector<16x48xf32>, vector<16x48xf32> -> vector<32x48xf32>
    %20 = vector.extract_strided_slice %19 {offsets = [0, 0], sizes = [32, 16], strides = [1, 1]} : vector<32x48xf32> to vector<32x16xf32>
    %21 = vector.extract_strided_slice %19 {offsets = [0, 16], sizes = [32, 16], strides = [1, 1]} : vector<32x48xf32> to vector<32x16xf32>
    %22 = vector.extract_strided_slice %19 {offsets = [0, 32], sizes = [32, 16], strides = [1, 1]} : vector<32x48xf32> to vector<32x16xf32>
    %23 = arith.truncf %20 : vector<32x16xf32> to vector<32x16xbf16>
    %24 = arith.truncf %21 : vector<32x16xf32> to vector<32x16xbf16>
    %cst_18 = arith.constant dense<0.000000e+00> : vector<32x32xf32>
    %25 = tpu.matmul %23, %24, %cst_18 {dimension_numbers = #tpu.dot_dimension_numbers<[1], [1], [0], [0], [0, 0, 1, 0], [], []>} : vector<32x16xbf16>, vector<32x16xbf16>, vector<32x32xf32> -> vector<32x32xf32>
    %cst_19 = arith.constant 2.500000e-01 : f32
    %26 = vector.broadcast %cst_19 : f32 to vector<32x32xf32>
    %27 = arith.mulf %25, %26 : vector<32x32xf32>
    %c0_20 = arith.constant 0 : index
    %c0_21 = arith.constant 0 : index
    %28 = vector.load %arg2[%c0_20, %c0_21] : memref<32x32xf32, #tpu.memory_space<vmem>>, vector<32x32xf32>
    %29 = arith.addf %27, %28 : vector<32x32xf32>
    %cst_22 = arith.constant dense<0xFF800000> : vector<32xf32>
    %30 = vector.multi_reduction <maximumf>, %29, %cst_22 [1] : vector<32x32xf32> to vector<32xf32>
    %31 = vector.shape_cast %30 : vector<32xf32> to vector<32x1xf32>
    %32 = vector.broadcast %31 : vector<32x1xf32> to vector<32x32xf32>
    %33 = arith.subf %29, %32 : vector<32x32xf32>
    %34 = math.exp %33 : vector<32x32xf32>
    %cst_23 = arith.constant dense<0.000000e+00> : vector<32xf32>
    %35 = vector.multi_reduction <add>, %34, %cst_23 [1] : vector<32x32xf32> to vector<32xf32>
    %36 = vector.shape_cast %35 : vector<32xf32> to vector<32x1xf32>
    %37 = tpu.reciprocal %36 {approx = true} : vector<32x1xf32> -> vector<32x1xf32>
    %38 = vector.broadcast %37 : vector<32x1xf32> to vector<32x32xf32>
    %39 = arith.mulf %34, %38 : vector<32x32xf32>
    %40 = arith.truncf %39 : vector<32x32xf32> to vector<32x32xbf16>
    %41 = arith.truncf %22 : vector<32x16xf32> to vector<32x16xbf16>
    %cst_24 = arith.constant dense<0.000000e+00> : vector<32x16xf32>
    %42 = tpu.matmul %40, %41, %cst_24 {dimension_numbers = #tpu.dot_dimension_numbers<[1], [0], [0], [1], [0, 0, 1, 1], [], []>} : vector<32x32xbf16>, vector<32x16xbf16>, vector<32x16xf32> -> vector<32x16xf32>
    %c0_25 = arith.constant 0 : index
    %c0_26 = arith.constant 0 : index
    %c0_27 = arith.constant 0 : index
    %43 = vector.load %arg8[%c0_25, %c0_26, %c0_27] : memref<1x1x32xf32, #tpu.memory_space<vmem>>, vector<1x1x32xf32>
    %44 = vector.shape_cast %43 : vector<1x1x32xf32> to vector<1x32xf32>
    %45 = vector.extract_strided_slice %42 {offsets = [0, 0], sizes = [16, 16], strides = [1, 1]} : vector<32x16xf32> to vector<16x16xf32>
    %46 = arith.truncf %45 : vector<16x16xf32> to vector<16x16xbf16>
    %c0_28 = arith.constant 0 : index
    %c0_29 = arith.constant 0 : index
    %c0_30 = arith.constant 0 : index
    %c0_31 = arith.constant 0 : index
    %47 = vector.load %arg7[%c0_28, %c0_29, %c0_30, %c0_31] : memref<1x2x16x32xbf16, #tpu.memory_space<vmem>>, vector<1x1x16x32xbf16>
    %48 = vector.shape_cast %47 : vector<1x1x16x32xbf16> to vector<16x32xbf16>
    %cst_32 = arith.constant dense<0.000000e+00> : vector<16x32xf32>
    %49 = tpu.matmul %46, %48, %cst_32 {dimension_numbers = #tpu.dot_dimension_numbers<[1], [0], [0], [1], [0, 0, 1, 1], [], []>} : vector<16x16xbf16>, vector<16x32xbf16>, vector<16x32xf32> -> vector<16x32xf32>
    %50 = vector.broadcast %44 : vector<1x32xf32> to vector<16x32xf32>
    %51 = arith.addf %50, %49 : vector<16x32xf32>
    %52 = vector.extract_strided_slice %42 {offsets = [16, 0], sizes = [16, 16], strides = [1, 1]} : vector<32x16xf32> to vector<16x16xf32>
    %53 = arith.truncf %52 : vector<16x16xf32> to vector<16x16xbf16>
    %c0_33 = arith.constant 0 : index
    %c1_34 = arith.constant 1 : index
    %c0_35 = arith.constant 0 : index
    %c0_36 = arith.constant 0 : index
    %54 = vector.load %arg7[%c0_33, %c1_34, %c0_35, %c0_36] : memref<1x2x16x32xbf16, #tpu.memory_space<vmem>>, vector<1x1x16x32xbf16>
    %55 = vector.shape_cast %54 : vector<1x1x16x32xbf16> to vector<16x32xbf16>
    %cst_37 = arith.constant dense<0.000000e+00> : vector<16x32xf32>
    %56 = tpu.matmul %53, %55, %cst_37 {dimension_numbers = #tpu.dot_dimension_numbers<[1], [0], [0], [1], [0, 0, 1, 1], [], []>} : vector<16x16xbf16>, vector<16x32xbf16>, vector<16x32xf32> -> vector<16x32xf32>
    %57 = arith.addf %51, %56 : vector<16x32xf32>
    %58 = arith.addf %57, %3 : vector<16x32xf32>
    %c0_38 = arith.constant 0 : index
    %c0_39 = arith.constant 0 : index
    %c0_40 = arith.constant 0 : index
    %59 = vector.load %arg9[%c0_38, %c0_39, %c0_40] : memref<1x1x32xf32, #tpu.memory_space<vmem>>, vector<1x1x32xf32>
    %60 = vector.shape_cast %59 : vector<1x1x32xf32> to vector<1x32xf32>
    %c0_41 = arith.constant 0 : index
    %c0_42 = arith.constant 0 : index
    %c0_43 = arith.constant 0 : index
    %61 = vector.load %arg10[%c0_41, %c0_42, %c0_43] : memref<1x1x32xf32, #tpu.memory_space<vmem>>, vector<1x1x32xf32>
    %62 = vector.shape_cast %61 : vector<1x1x32xf32> to vector<1x32xf32>
    %cst_44 = arith.constant dense<0.000000e+00> : vector<16xf32>
    %63 = vector.multi_reduction <add>, %58, %cst_44 [1] : vector<16x32xf32> to vector<16xf32>
    %64 = vector.shape_cast %63 : vector<16xf32> to vector<16x1xf32>
    %cst_45 = arith.constant 3.200000e+01 : f32
    %65 = vector.broadcast %cst_45 : f32 to vector<16x1xf32>
    %66 = arith.divf %64, %65 : vector<16x1xf32>
    %67 = vector.broadcast %66 : vector<16x1xf32> to vector<16x32xf32>
    %68 = arith.subf %58, %67 : vector<16x32xf32>
    %69 = arith.mulf %68, %68 : vector<16x32xf32>
    %cst_46 = arith.constant dense<0.000000e+00> : vector<16xf32>
    %70 = vector.multi_reduction <add>, %69, %cst_46 [1] : vector<16x32xf32> to vector<16xf32>
    %71 = vector.shape_cast %70 : vector<16xf32> to vector<16x1xf32>
    %cst_47 = arith.constant 3.200000e+01 : f32
    %72 = vector.broadcast %cst_47 : f32 to vector<16x1xf32>
    %73 = arith.divf %71, %72 : vector<16x1xf32>
    %cst_48 = arith.constant 9.99999996E-13 : f32
    %74 = vector.broadcast %cst_48 : f32 to vector<16x1xf32>
    %75 = arith.addf %73, %74 : vector<16x1xf32>
    %76 = math.rsqrt %75 : vector<16x1xf32>
    %77 = vector.broadcast %76 : vector<16x1xf32> to vector<16x32xf32>
    %78 = arith.mulf %68, %77 : vector<16x32xf32>
    %79 = vector.broadcast %60 : vector<1x32xf32> to vector<16x32xf32>
    %80 = arith.mulf %78, %79 : vector<16x32xf32>
    %81 = vector.broadcast %62 : vector<1x32xf32> to vector<16x32xf32>
    %82 = arith.addf %80, %81 : vector<16x32xf32>
    %83 = arith.truncf %82 : vector<16x32xf32> to vector<16x32xbf16>
    %c0_49 = arith.constant 0 : index
    %c0_50 = arith.constant 0 : index
    %c0_51 = arith.constant 0 : index
    %84 = vector.load %arg11[%c0_49, %c0_50, %c0_51] : memref<1x32x64xbf16, #tpu.memory_space<vmem>>, vector<1x32x64xbf16>
    %85 = vector.shape_cast %84 : vector<1x32x64xbf16> to vector<32x64xbf16>
    %cst_52 = arith.constant dense<0.000000e+00> : vector<16x64xf32>
    %86 = tpu.matmul %83, %85, %cst_52 {dimension_numbers = #tpu.dot_dimension_numbers<[1], [0], [0], [1], [0, 0, 1, 1], [], []>} : vector<16x32xbf16>, vector<32x64xbf16>, vector<16x64xf32> -> vector<16x64xf32>
    %c0_53 = arith.constant 0 : index
    %c0_54 = arith.constant 0 : index
    %c0_55 = arith.constant 0 : index
    %87 = vector.load %arg12[%c0_53, %c0_54, %c0_55] : memref<1x1x64xf32, #tpu.memory_space<vmem>>, vector<1x1x64xf32>
    %88 = vector.shape_cast %87 : vector<1x1x64xf32> to vector<1x64xf32>
    %89 = vector.broadcast %88 : vector<1x64xf32> to vector<16x64xf32>
    %90 = arith.addf %86, %89 : vector<16x64xf32>
    %cst_56 = arith.constant 5.000000e-01 : f32
    %91 = vector.broadcast %cst_56 : f32 to vector<16x64xf32>
    %92 = arith.mulf %91, %90 : vector<16x64xf32>
    %cst_57 = arith.constant 4.471500e-02 : f32
    %93 = vector.broadcast %cst_57 : f32 to vector<16x64xf32>
    %94 = arith.mulf %93, %90 : vector<16x64xf32>
    %95 = arith.mulf %94, %90 : vector<16x64xf32>
    %96 = arith.mulf %95, %90 : vector<16x64xf32>
    %97 = arith.addf %90, %96 : vector<16x64xf32>
    %cst_58 = arith.constant 0.797884583 : f32
    %98 = vector.broadcast %cst_58 : f32 to vector<16x64xf32>
    %99 = arith.mulf %98, %97 : vector<16x64xf32>
    %100 = math.tanh %99 : vector<16x64xf32>
    %cst_59 = arith.constant 1.000000e+00 : f32
    %101 = vector.broadcast %cst_59 : f32 to vector<16x64xf32>
    %102 = arith.addf %101, %100 : vector<16x64xf32>
    %103 = arith.mulf %92, %102 : vector<16x64xf32>
    %104 = arith.truncf %103 : vector<16x64xf32> to vector<16x64xbf16>
    %c0_60 = arith.constant 0 : index
    %c0_61 = arith.constant 0 : index
    %c0_62 = arith.constant 0 : index
    %105 = vector.load %arg13[%c0_60, %c0_61, %c0_62] : memref<1x64x32xbf16, #tpu.memory_space<vmem>>, vector<1x64x32xbf16>
    %106 = vector.shape_cast %105 : vector<1x64x32xbf16> to vector<64x32xbf16>
    %cst_63 = arith.constant dense<0.000000e+00> : vector<16x32xf32>
    %107 = tpu.matmul %104, %106, %cst_63 {dimension_numbers = #tpu.dot_dimension_numbers<[1], [0], [0], [1], [0, 0, 1, 1], [], []>} : vector<16x64xbf16>, vector<64x32xbf16>, vector<16x32xf32> -> vector<16x32xf32>
    %c0_64 = arith.constant 0 : index
    %c0_65 = arith.constant 0 : index
    %c0_66 = arith.constant 0 : index
    %108 = vector.load %arg14[%c0_64, %c0_65, %c0_66] : memref<1x1x32xf32, #tpu.memory_space<vmem>>, vector<1x1x32xf32>
    %109 = vector.shape_cast %108 : vector<1x1x32xf32> to vector<1x32xf32>
    %110 = vector.broadcast %109 : vector<1x32xf32> to vector<16x32xf32>
    %111 = arith.addf %107, %110 : vector<16x32xf32>
    %112 = arith.addf %111, %82 : vector<16x32xf32>
    %c0_67 = arith.constant 0 : index
    %c0_68 = arith.constant 0 : index
    %c0_69 = arith.constant 0 : index
    %113 = vector.load %arg15[%c0_67, %c0_68, %c0_69] : memref<1x1x32xf32, #tpu.memory_space<vmem>>, vector<1x1x32xf32>
    %114 = vector.shape_cast %113 : vector<1x1x32xf32> to vector<1x32xf32>
    %c0_70 = arith.constant 0 : index
    %c0_71 = arith.constant 0 : index
    %c0_72 = arith.constant 0 : index
    %115 = vector.load %arg16[%c0_70, %c0_71, %c0_72] : memref<1x1x32xf32, #tpu.memory_space<vmem>>, vector<1x1x32xf32>
    %116 = vector.shape_cast %115 : vector<1x1x32xf32> to vector<1x32xf32>
    %cst_73 = arith.constant dense<0.000000e+00> : vector<16xf32>
    %117 = vector.multi_reduction <add>, %112, %cst_73 [1] : vector<16x32xf32> to vector<16xf32>
    %118 = vector.shape_cast %117 : vector<16xf32> to vector<16x1xf32>
    %cst_74 = arith.constant 3.200000e+01 : f32
    %119 = vector.broadcast %cst_74 : f32 to vector<16x1xf32>
    %120 = arith.divf %118, %119 : vector<16x1xf32>
    %121 = vector.broadcast %120 : vector<16x1xf32> to vector<16x32xf32>
    %122 = arith.subf %112, %121 : vector<16x32xf32>
    %123 = arith.mulf %122, %122 : vector<16x32xf32>
    %cst_75 = arith.constant dense<0.000000e+00> : vector<16xf32>
    %124 = vector.multi_reduction <add>, %123, %cst_75 [1] : vector<16x32xf32> to vector<16xf32>
    %125 = vector.shape_cast %124 : vector<16xf32> to vector<16x1xf32>
    %cst_76 = arith.constant 3.200000e+01 : f32
    %126 = vector.broadcast %cst_76 : f32 to vector<16x1xf32>
    %127 = arith.divf %125, %126 : vector<16x1xf32>
    %cst_77 = arith.constant 9.99999996E-13 : f32
    %128 = vector.broadcast %cst_77 : f32 to vector<16x1xf32>
    %129 = arith.addf %127, %128 : vector<16x1xf32>
    %130 = math.rsqrt %129 : vector<16x1xf32>
    %131 = vector.broadcast %130 : vector<16x1xf32> to vector<16x32xf32>
    %132 = arith.mulf %122, %131 : vector<16x32xf32>
    %133 = vector.broadcast %114 : vector<1x32xf32> to vector<16x32xf32>
    %134 = arith.mulf %132, %133 : vector<16x32xf32>
    %135 = vector.broadcast %116 : vector<1x32xf32> to vector<16x32xf32>
    %136 = arith.addf %134, %135 : vector<16x32xf32>
    %c0_78 = arith.constant 0 : index
    %c0_79 = arith.constant 0 : index
    %137 = vector.load %arg22[%c0_78, %c0_79] : memref<16x32xf32, #tpu.memory_space<vmem>>, vector<16x32xf32>
    tpu.vector_store %arg22[%c0_78, %c0_79], %136 {strides = array<i32>} : memref<16x32xf32, #tpu.memory_space<vmem>>, vector<16x32xf32>,
    %c1_i32 = arith.constant 1 : i32
    %138 = arith.cmpi eq, %arg0, %c1_i32 : i32
    %139 = arith.extui %138 : i1 to i32
    %c0_i32_80 = arith.constant 0 : i32
    %140 = arith.cmpi ne, %139, %c0_i32_80 : i32
    scf.if %140 {
      %c0_81 = arith.constant 0 : index
      %c0_82 = arith.constant 0 : index
      %141 = tpu.strided_load %arg22[%c0_81, %c0_82] {strides = array<i32: 8, 1>} : memref<16x32xf32, #tpu.memory_space<vmem>>, vector<2x32xf32>
      %c0_83 = arith.constant 0 : index
      %c0_84 = arith.constant 0 : index
      %142 = vector.load %arg17[%c0_83, %c0_84] : memref<32x32xf32, #tpu.memory_space<vmem>>, vector<32x32xf32>
      %cst_85 = arith.constant dense<0.000000e+00> : vector<2x32xf32>
      %143 = tpu.matmul %141, %142, %cst_85 {dimension_numbers = #tpu.dot_dimension_numbers<[1], [0], [0], [1], [0, 0, 1, 1], [], []>} : vector<2x32xf32>, vector<32x32xf32>, vector<2x32xf32> -> vector<2x32xf32>
      %c0_86 = arith.constant 0 : index
      %c0_87 = arith.constant 0 : index
      %144 = vector.load %arg18[%c0_86, %c0_87] : memref<1x32xf32, #tpu.memory_space<vmem>>, vector<1x32xf32>
      %145 = vector.broadcast %144 : vector<1x32xf32> to vector<2x32xf32>
      %146 = arith.addf %143, %145 : vector<2x32xf32>
      %147 = math.tanh %146 : vector<2x32xf32>
      %c0_88 = arith.constant 0 : index
      %c0_89 = arith.constant 0 : index
      %148 = vector.load %arg19[%c0_88, %c0_89] : memref<32x128xf32, #tpu.memory_space<vmem>>, vector<32x128xf32>
      %cst_90 = arith.constant dense<0.000000e+00> : vector<2x128xf32>
      %149 = tpu.matmul %147, %148, %cst_90 {dimension_numbers = #tpu.dot_dimension_numbers<[1], [0], [0], [1], [0, 0, 1, 1], [], []>} : vector<2x32xf32>, vector<32x128xf32>, vector<2x128xf32> -> vector<2x128xf32>
      %c0_91 = arith.constant 0 : index
      %c0_92 = arith.constant 0 : index
      %150 = vector.load %arg20[%c0_91, %c0_92] : memref<1x128xf32, #tpu.memory_space<vmem>>, vector<1x128xf32>
      %151 = vector.broadcast %150 : vector<1x128xf32> to vector<2x128xf32>
      %152 = arith.addf %149, %151 : vector<2x128xf32>
      %cst_93 = arith.constant 0.000000e+00 : f32
      %153 = vector.broadcast %cst_93 : f32 to vector<2x128xf32>
      %154 = arith.subf %153, %152 : vector<2x128xf32>
      %155 = math.exp %154 : vector<2x128xf32>
      %cst_94 = arith.constant 1.000000e+00 : f32
      %156 = vector.broadcast %cst_94 : f32 to vector<2x128xf32>
      %157 = arith.addf %156, %155 : vector<2x128xf32>
      %cst_95 = arith.constant 1.000000e+00 : f32
      %158 = vector.broadcast %cst_95 : f32 to vector<2x128xf32>
      %159 = arith.divf %158, %157 : vector<2x128xf32>
      %c0_96 = arith.constant 0 : index
      %c0_97 = arith.constant 0 : index
      %160 = vector.load %arg21[%c0_96, %c0_97] : memref<2x128xf32, #tpu.memory_space<vmem>>, vector<2x128xf32>
      tpu.vector_store %arg21[%c0_96, %c0_97], %159 {strides = array<i32>} : memref<2x128xf32, #tpu.memory_space<vmem>>, vector<2x128xf32>,
    } else {
    }
    return
  }
  func.func @transform_0(%arg0: i32) -> (i32, i32) {
    %c0_i32 = arith.constant 0 : i32
    %c0_i32_0 = arith.constant 0 : i32
    %c0_i32_1 = arith.constant 0 : i32
    return %c0_i32, %c0_i32_0 : i32, i32
  }
  func.func @transform_1(%arg0: i32) -> (i32, i32) {
    %c0_i32 = arith.constant 0 : i32
    %c0_i32_0 = arith.constant 0 : i32
    %c0_i32_1 = arith.constant 0 : i32
    return %c0_i32, %c0_i32_0 : i32, i32
  }
  func.func @transform_2(%arg0: i32) -> (i32, i32) {
    %c0_i32 = arith.constant 0 : i32
    %c0_i32_0 = arith.constant 0 : i32
    %c0_i32_1 = arith.constant 0 : i32
    return %c0_i32, %c0_i32_0 : i32, i32
  }
  func.func @transform_3(%arg0: i32) -> (i32, i32) {
    %c0_i32 = arith.constant 0 : i32
    %c0_i32_0 = arith.constant 0 : i32
    %c0_i32_1 = arith.constant 0 : i32
    return %c0_i32, %c0_i32_0 : i32, i32
  }
  func.func @transform_4(%arg0: i32) -> (i32, i32, i32, i32) {
    %c0_i32 = arith.constant 0 : i32
    %c0_i32_0 = arith.constant 0 : i32
    %c0_i32_1 = arith.constant 0 : i32
    %c0_i32_2 = arith.constant 0 : i32
    return %arg0, %c0_i32, %c0_i32_0, %c0_i32_1 : i32, i32, i32, i32
  }
  func.func @transform_5(%arg0: i32) -> (i32, i32, i32, i32) {
    %c0_i32 = arith.constant 0 : i32
    %c0_i32_0 = arith.constant 0 : i32
    %c0_i32_1 = arith.constant 0 : i32
    %c0_i32_2 = arith.constant 0 : i32
    return %arg0, %c0_i32, %c0_i32_0, %c0_i32_1 : i32, i32, i32, i32
  }
  func.func @transform_6(%arg0: i32) -> (i32, i32, i32, i32) {
    %c0_i32 = arith.constant 0 : i32
    %c0_i32_0 = arith.constant 0 : i32
    %c0_i32_1 = arith.constant 0 : i32
    %c0_i32_2 = arith.constant 0 : i32
    return %arg0, %c0_i32, %c0_i32_0, %c0_i32_1 : i32, i32, i32, i32
  }
  func.func @transform_7(%arg0: i32) -> (i32, i32, i32) {
    %c0_i32 = arith.constant 0 : i32
    %c0_i32_0 = arith.constant 0 : i32
    %c0_i32_1 = arith.constant 0 : i32
    return %arg0, %c0_i32, %c0_i32_0 : i32, i32, i32
  }
  func.func @transform_8(%arg0: i32) -> (i32, i32, i32) {
    %c0_i32 = arith.constant 0 : i32
    %c0_i32_0 = arith.constant 0 : i32
    %c0_i32_1 = arith.constant 0 : i32
    return %arg0, %c0_i32, %c0_i32_0 : i32, i32, i32
  }
  func.func @transform_9(%arg0: i32) -> (i32, i32, i32) {
    %c0_i32 = arith.constant 0 : i32
    %c0_i32_0 = arith.constant 0 : i32
    %c0_i32_1 = arith.constant 0 : i32
    return %arg0, %c0_i32, %c0_i32_0 : i32, i32, i32
  }
  func.func @transform_10(%arg0: i32) -> (i32, i32, i32) {
    %c0_i32 = arith.constant 0 : i32
    %c0_i32_0 = arith.constant 0 : i32
    %c0_i32_1 = arith.constant 0 : i32
    return %arg0, %c0_i32, %c0_i32_0 : i32, i32, i32
  }
  func.func @transform_11(%arg0: i32) -> (i32, i32, i32) {
    %c0_i32 = arith.constant 0 : i32
    %c0_i32_0 = arith.constant 0 : i32
    %c0_i32_1 = arith.constant 0 : i32
    return %arg0, %c0_i32, %c0_i32_0 : i32, i32, i32
  }
  func.func @transform_12(%arg0: i32) -> (i32, i32, i32) {
    %c0_i32 = arith.constant 0 : i32
    %c0_i32_0 = arith.constant 0 : i32
    %c0_i32_1 = arith.constant 0 : i32
    return %arg0, %c0_i32, %c0_i32_0 : i32, i32, i32
  }
  func.func @transform_13(%arg0: i32) -> (i32, i32, i32) {
    %c0_i32 = arith.constant 0 : i32
    %c0_i32_0 = arith.constant 0 : i32
    %c0_i32_1 = arith.constant 0 : i32
    return %arg0, %c0_i32, %c0_i32_0 : i32, i32, i32
  }
  func.func @transform_14(%arg0: i32) -> (i32, i32, i32) {
    %c0_i32 = arith.constant 0 : i32
    %c0_i32_0 = arith.constant 0 : i32
    %c0_i32_1 = arith.constant 0 : i32
    return %arg0, %c0_i32, %c0_i32_0 : i32, i32, i32
  }
  func.func @transform_15(%arg0: i32) -> (i32, i32, i32) {
    %c0_i32 = arith.constant 0 : i32
    %c0_i32_0 = arith.constant 0 : i32
    %c0_i32_1 = arith.constant 0 : i32
    return %arg0, %c0_i32, %c0_i32_0 : i32, i32, i32
  }
  func.func @transform_16(%arg0: i32) -> (i32, i32) {
    %c0_i32 = arith.constant 0 : i32
    %c0_i32_0 = arith.constant 0 : i32
    %c0_i32_1 = arith.constant 0 : i32
    return %c0_i32, %c0_i32_0 : i32, i32
  }
  func.func @transform_17(%arg0: i32) -> (i32, i32) {
    %c0_i32 = arith.constant 0 : i32
    %c0_i32_0 = arith.constant 0 : i32
    %c0_i32_1 = arith.constant 0 : i32
    return %c0_i32, %c0_i32_0 : i32, i32
  }
  func.func @transform_18(%arg0: i32) -> (i32, i32) {
    %c0_i32 = arith.constant 0 : i32
    %c0_i32_0 = arith.constant 0 : i32
    %c0_i32_1 = arith.constant 0 : i32
    return %c0_i32, %c0_i32_0 : i32, i32
  }
  func.func @transform_19(%arg0: i32) -> (i32, i32) {
    %c0_i32 = arith.constant 0 : i32
    %c0_i32_0 = arith.constant 0 : i32
    %c0_i32_1 = arith.constant 0 : i32
    return %c0_i32, %c0_i32_0 : i32, i32
  }
  func.func @transform_20(%arg0: i32) -> (i32, i32) {
    %c0_i32 = arith.constant 0 : i32
    %c0_i32_0 = arith.constant 0 : i32
    %c0_i32_1 = arith.constant 0 : i32
    return %c0_i32, %c0_i32_0 : i32, i32
  }
}

</mosaic_0001>

<bundles_post_ra>
// kernel: tpu_custom_call.1
= control target key start
LH: loop header
LB: loop body
LE: loop exit
PB: predicated region body
PF: predicated region fallthrough
CT: control target
= control target key end

     0   :  { %s4118_s0 = inlined_call_operand.hbm [shape: f32[16,32], index: 0, kind: input, shape index: {}]   ;;  %s4119_s1 = inlined_call_operand.vmem [shape: f32[32,32], index: 1, kind: input, shape index: {}]   ;;  %s4120_s2 = inlined_call_operand.hbm [shape: f32[1,32], index: 2, kind: input, shape index: {}]   ;;  %s4121_s3 = inlined_call_operand.hbm [shape: f32[1,32], index: 3, kind: input, shape index: {}]   ;;  %s4122_s4 = inlined_call_operand.vmem [shape: bf16[2,2,32,48], index: 4, kind: input, shape index: {}]   ;;  %s4123_s5 = inlined_call_operand.hbm [shape: f32[2,2,1,48], index: 5, kind: input, shape index: {}]   ;;  %s4124_s6 = inlined_call_operand.hbm [shape: bf16[2,2,16,32], index: 6, kind: input, shape index: {}]   ;;  %s4125_s7 = inlined_call_operand.hbm [shape: f32[2,1,32], index: 7, kind: input, shape index: {}]   ;;  %s4126_s8 = inlined_call_operand.hbm [shape: f32[2,1,32], index: 8, kind: input, shape index: {}]   ;;  %s4127_s9 = inlined_call_operand.hbm [shape: f32[2,1,32], index: 9, kind: input, shape index: {}]   ;;  %s4128_s10 = inlined_call_operand.hbm [shape: bf16[2,32,64], index: 10, kind: input, shape index: {}]   ;;  %s4129_s11 = inlined_call_operand.hbm [shape: f32[2,1,64], index: 11, kind: input, shape index: {}]   ;;  %s4130_s12 = inlined_call_operand.vmem [shape: bf16[2,64,32], index: 12, kind: input, shape index: {}]   ;;  %s4131_s13 = inlined_call_operand.hbm [shape: f32[2,1,32], index: 13, kind: input, shape index: {}]   ;;  %s4132_s14 = inlined_call_operand.hbm [shape: f32[2,1,32], index: 14, kind: input, shape index: {}]   ;;  %s4133_s15 = inlined_call_operand.hbm [shape: f32[2,1,32], index: 15, kind: input, shape index: {}]   ;;  %s4134_s16 = inlined_call_operand.hbm [shape: f32[32,32], index: 16, kind: input, shape index: {}]   ;;  %s4135_s17 = inlined_call_operand.hbm [shape: f32[1,32], index: 17, kind: input, shape index: {}]   ;;  %s4136_s18 = inlined_call_operand.vmem [shape: f32[32,128], index: 18, kind: input, shape index: {}]   ;;  %s4137_s19 = inlined_call_operand.vmem [shape: f32[1,128], index: 19, kind: input, shape index: {}]   ;;  %s4138_s20 = inlined_call_operand.hbm [shape: f32[2,128], index: 20, kind: output, shape index: {}]  }
   0x1   :  { %4176 = sst [smem:[#allocation44_spill]] %s4118_s0 }
   0x2   :  { %4177 = sst [smem:[#allocation45_spill]] %s4119_s1 }
   0x3   :  { %4178 = sst [smem:[#allocation46_spill]] %s4120_s2 }
   0x4   :  { %4179 = sst [smem:[#allocation47_spill]] %s4121_s3 }
   0x5   :  { %4180 = sst [smem:[#allocation48_spill]] %s4122_s4 }
   0x6   :  { %4181 = sst [smem:[#allocation49_spill]] %s4123_s5 }
   0x7   :  { %4182 = sst [smem:[#allocation50_spill]] %s4125_s7 }
   0x8   :  { %4183 = sst [smem:[#allocation51_spill]] %s4127_s9 }
   0x9   :  { %4184 = sst [smem:[#allocation52_spill]] %s4129_s11 }
   0xa   :  { %4185 = sst [smem:[#allocation53_spill]] %s4130_s12 }
   0xb   :  { %4186 = sst [smem:[#allocation54_spill]] %s4132_s14 }
   0xc   :  { %4187 = sst [smem:[#allocation55_spill]] %s4134_s16 }
   0xd   :  { %4188 = sst [smem:[#allocation56_spill]] %s4136_s18 }
   0xe   :  { %4189 = sst [smem:[#allocation57_spill]] %s4137_s19 }
   0xf   :  { %4190 = sst [smem:[#allocation58_spill]] %s4138_s20 }
  0x10   :  { %25 = vsyncpa [#allocation4], 0 }
  0x11   :  { %26 = vsyncpa [#allocation7], 0 }
  0x12   :  { %27 = vsyncpa [#allocation10], 0 }
  0x13   :  { %29 = vsyncpa [#allocation10 + $0x1], 0 }
  0x14   :  { %30 = vsyncpa [#allocation13], 0 }
  0x15   :  { %32 = vsyncpa [#allocation13 + $0x1], 0 }
  0x16   :  { %33 = vsyncpa [#allocation16], 0 }
  0x17   :  { %35 = vsyncpa [#allocation16 + $0x1], 0 }
  0x18   :  { %36 = vsyncpa [#allocation19], 0 }
  0x19   :  { %38 = vsyncpa [#allocation19 + $0x1], 0 }
  0x1a   :  { %39 = vsyncpa [#allocation22], 0 }
  0x1b   :  { %41 = vsyncpa [#allocation22 + $0x1], 0 }
  0x1c   :  { %42 = vsyncpa [#allocation25], 0 }
  0x1d   :  { %43 = vsyncpa [#allocation5], 0  ;;  %s3395_s1 = smov 0   ;;  %s3397_s22 = smov 0  }
  0x1e   :  { %s3399_s23 = smov 0   ;;  %s3401_s24 = smov 0  }
  0x1f LB: > { %4191 = sst [smem:[#allocation37_spill]] %s3251_s22  ;;  %s3414_s2 = sadd.s32 4294967295, %s3259_s24   ;;  %s3259_s24 = sphi %s3401_s24, %s4254_s24   ;;  %s3255_s23 = sphi %s3399_s23, %s4257_s23   ;;  %s3251_s22 = sphi %s3397_s22, %s4256_s22   ;;  %s3247_s1 = sphi %s3395_s1, %s4255_s1  }
  0x20   : > { %4192 = sst [smem:[#allocation38_spill]] %s3255_s23  ;;  %s3417_s25 = sadd.s32 1, %s3259_s24  }
  0x21   : > { %4193 = sst [smem:[#allocation39_spill]] %s3414_s2  ;;  %s163_s3 = ssub.s32 %s3259_s24, %s3417_s25 }
  0x22   : > { %4194 = sst [smem:[#allocation40_spill]] %s3417_s25  ;;  %s166_s26 = sadd.s32 1, %s3255_s23 }
  0x23   : > { %p164_p0 = scmp.eq.s32.totalorder %s163_s3, 0  ;;  %p173_p1 = scmp.ne.s32.totalorder %s3255_s23, %s3251_s22 }
  0x24   : > { %p174_p2 = scmp.eq.s32.totalorder %s3259_s24, 0  ;;  %p179_p3 = scmp.ne.s32.totalorder %s3251_s22, %s3247_s1 }
  0x25   : > { %s3427_s27 = scalar_select %p164_p0, %s3255_s23, %s166_s26  }
  0x26   : > { %p3429_p4 = por %p174_p2, %p173_p1  ;;  %p4149_p5 = scmp.eq.s32.totalorder %s3414_s2, 0 }
  0x27   : > { %4195 = sst [smem:[#allocation41_spill]] %s3427_s27  ;;  %p2295_p6 = scmp.ge.s32.totalorder %s3259_s24, 1 }
  0x28   : > { %p555_p7 = scmp.lt.s32.totalorder %s3259_s24, 3  ;;  %p3438_p8 = por %p4149_p5, %p179_p3 }
  0x29   : > { %s3261_s30 = smov [#allocation6]   ;;  %p2618_p12 = scmp.lt.s32.totalorder %s3259_s24, 2 }
  0x2a   : > { %s4197_s4 = scalar_select %p3438_p8, 1, 0 }
  0x2b   : > { %p3443_p10 = pnand %p2295_p6, %p555_p7  ;;  %s584_s0 = sshll.u32 %s3261_s30, 4  ;;  %s585_s0 = int_to_ptr.vmem [resolvable:$true] %s584_s0 }
  0x2c   : > { %4198 = sst [smem:[#allocation42_spill]] %s4197_s4  ;;  %p3458_p0 = pnand %p2618_p12, %p3429_p4 }
  0x2d   : > { %s4199_s29 = scalar_select %p3443_p10, 1, 0 }
  0x2e   : > { %p2566_p11 = pneg %p3443_p10  ;;  %s3262_s3 = smov [#allocation24]  }
  0x2f   : > { %4200 = sst [smem:[#allocation43_spill]] %s4199_s29  ;;  %s605_s26 = sshll.u32 %s3262_s3, 4  ;;  %s606_s26 = int_to_ptr.vmem [resolvable:$true] %s605_s26 }
  0x30   : > { %p3452_p13 = pnand %p2566_p11, %p4149_p5  ;;  %s4203_s30 = sld [smem:[#allocation46_spill]] }
  0x31   : > { %s4202_s1 = scalar_select %p3458_p0, 1, 0 }
  0x32   : > { %s4201_s21 = scalar_select %p3452_p13, 1, 0 }
  0x33   : > { %p3470_p2 = pneg %p3452_p13 }
  0x35   : > { %s4204_s12 = scalar_select %p3470_p2, 1, 0 }
  0x36   : > { %s2727_s20 = scalar_lea.hbm %s4203_s30, 16 }
  0x37   : > { %p2728_p1 = scmp.ne.s32.totalorder %s4203_s30, %s2727_s20  ;;  %p2734_p6 = scmp.lt.u32.totalorder %s2727_s20, %s4203_s30 }
  0x39   : > { %p2730_p3 = pnand %p3470_p2, %p2728_p1 }
  0x3b   : > { %p2731_p4 = pneg %p2730_p3 }
  0x3d   : > { %p2736_p7 = pnand %p2734_p6, %p2731_p4 }
  0x3f   : > { %2739 = shalt.err (!%p2736_p7)
}
  0x40   : > { %s2740_s25 = scalar_lea.vmem %s585_s0, 16  ;;  %s2747_s18 = scalar_lea.vmem %s585_s0, 32 }
  0x41   : > { %p2741_p11 = scmp.ne.s32.totalorder %s585_s0, %s2740_s25  ;;  %p2748_p5 = scmp.lt.s32.totalorder %s585_s0, %s585_s0 }
  0x42   : > { %p2749_p8 = scmp.lt.s32.totalorder %s2747_s18, %s2740_s25 }
  0x43   : > { %p2743_p12 = pnand %p2741_p11, %p3470_p2 }
  0x44   : > { %p2750_p10 = por %p2749_p8, %p2748_p5 }
  0x45   : > { %p2744_p9 = pneg %p2743_p12 }
  0x47   : > { %p2751_p0 = pnand %p2750_p10, %p2744_p9 }
  0x49   : > { %2754 = shalt.err (!%p2751_p0)
}
  0x4a   : > { %2572 = dma.hbm_to_vmem [thread:$0]  (!%p3452_p13), %s4203_s30, 16, %s585_s0, [#allocation7]  }
  0x4b   : > { %s4205_s16 = sld [smem:[#allocation55_spill]] }
  0x51   : > { %s2755_s3 = scalar_lea.hbm %s4205_s16, 512 }
  0x52   : > { %p2756_p1 = scmp.ne.s32.totalorder %s4205_s16, %s2755_s3  ;;  %p2762_p9 = scmp.lt.u32.totalorder %s2755_s3, %s4205_s16 }
  0x54   : > { %p2758_p5 = pnand %p2756_p1, %p3470_p2 }
  0x56   : > { %p2759_p8 = pneg %p2758_p5 }
  0x58   : > { %p2764_p10 = pnand %p2762_p9, %p2759_p8 }
  0x5a   : > { %2767 = shalt.err (!%p2764_p10)
}
  0x5b   : > { %s2768_s19 = scalar_lea.vmem %s606_s26, 512  ;;  %p2776_p6 = scmp.lt.s32.totalorder %s606_s26, %s606_s26 }
  0x5c   : > { %p2769_p0 = scmp.ne.s32.totalorder %s606_s26, %s2768_s19  ;;  %p2777_p7 = scmp.lt.s32.totalorder %s2768_s19, %s2768_s19 }
  0x5e   : > { %p2771_p3 = pnand %p2769_p0, %p3470_p2  ;;  %p2778_p11 = por %p2777_p7, %p2776_p6 }
  0x60   : > { %p2772_p4 = pneg %p2771_p3 }
  0x62   : > { %p2779_p12 = pnand %p2778_p11, %p2772_p4 }
  0x64   : > { %2782 = shalt.err (!%p2779_p12)
}
  0x65   : > { %s4158_s22 = smov 128   ;;  %s4159_s0 = smov 8  }
  0x66   : > { %2578 = dma.hbm_to_vmem [thread:$0]  (!%p3452_p13), %s4205_s16, 512, %s606_s26, [#allocation25], %s4158_s22, %s4158_s22, %s4159_s0  }
  0x67   : > { %s3508_s4 = sand.u32 1, %s3259_s24   ;;  %s3511_s3 = sand.u32 1, %s3255_s23  }
  0x68   : > { %s2302_s28 = sshll.u32 %s3511_s3, 1  ;;  %s2381_s25 = sshll.u32 %s3259_s24, 5 }
  0x69   : > { %s4206_s5 = sld [smem:[#allocation49_spill]]  ;;  %s648_s2 = scalar_lea.vmem [#allocation9], %s2302_s28 }
  0x6a   : > { %s655_s27 = sshll.u32 %s648_s2, 4  ;;  %s4165_s26 = scalar_lea.sflag [#allocation10], %s3508_s4  ;;  %s3520_s27 = int_to_ptr.vmem [resolvable:$true] %s655_s27 }
  0x6b   : > { %p4207_p5 = scmp.ne.s32.totalorder %s4202_s1, 0 }
  0x6d   : > { %p3527_p8 = pneg %p4207_p5 }
  0x6f   : > { %s3518_s30 = scalar_lea.hbm %s4206_s5, %s2381_s25  ;;  %s2788_s19 = scalar_lea.hbm %s4206_s5, 64 }
  0x70   : > { %s2783_s20 = scalar_lea.hbm %s3518_s30, 32  ;;  %p2789_p0 = scmp.lt.u32.totalorder %s3518_s30, %s4206_s5 }
  0x71   : > { %p2784_p1 = scmp.ne.s32.totalorder %s3518_s30, %s2783_s20  ;;  %p2790_p3 = scmp.lt.u32.totalorder %s2788_s19, %s2783_s20 }
  0x72   : > { %s4208_s22 = scalar_select %p3527_p8, 1, 0 }
  0x73   : > { %p2786_p9 = pnand %p3527_p8, %p2784_p1  ;;  %p2791_p4 = por %p2790_p3, %p2789_p0 }
  0x74   : > { %p2792_p6 = scmp.lt.u32.totalorder %s2783_s20, %s3518_s30 }
  0x75   : > { %p2787_p10 = pneg %p2786_p9 }
  0x76   : > { %p2793_p7 = por %p2792_p6, %p2791_p4 }
  0x78   : > { %p2794_p11 = pnand %p2793_p7, %p2787_p10 }
  0x7a   : > { %2797 = shalt.err (!%p2794_p11)
}
  0x7b   : > { %s2798_s0 = scalar_lea.vmem %s3520_s27, 32  ;;  %s3265_s25 = smov [#allocation9]  }
  0x7c   : > { %p2799_p12 = scmp.ne.s32.totalorder %s3520_s27, %s2798_s0  ;;  %s2803_s18 = sshll.u32 %s3265_s25, 4  ;;  %s2804_s18 = int_to_ptr.vmem [resolvable:$false] %s2803_s18 }
  0x7d   : > { %s2805_s28 = scalar_lea.vmem %s2804_s18, 64  ;;  %p2806_p13 = scmp.lt.s32.totalorder %s3520_s27, %s2804_s18 }
  0x7e   : > { %p2801_p1 = pnand %p2799_p12, %p3527_p8  ;;  %p2807_p2 = scmp.lt.s32.totalorder %s2805_s28, %s2798_s0 }
  0x80   : > { %p2802_p9 = pneg %p2801_p1  ;;  %p2808_p0 = por %p2807_p2, %p2806_p13 }
  0x82   : > { %p2809_p3 = pnand %p2808_p0, %p2802_p9 }
  0x84   : > { %2812 = shalt.err (!%p2809_p3)
}
  0x85   : > { %s3266_s20 = smov 16   ;;  %s3267_s19 = smov 1  }
  0x86   : > { %2585 = dma.hbm_to_vmem [thread:$0]  (!%p4207_p5), %s3518_s30, 32, %s3520_s27, %s4165_s26, %s3266_s20, %s3266_s20, %s3267_s19  }
  0x87   : > { %s3553_s2 = sshll.u32 %s3259_s24, 4  ;;  %s4209_s7 = sld [smem:[#allocation50_spill]] }
  0x88   : > { %s689_s28 = scalar_lea.vmem [#allocation12], %s3511_s3  ;;  %s4167_s16 = scalar_lea.sflag [#allocation13], %s3508_s4 }
  0x89   : > { %s696_s5 = sshll.u32 %s689_s28, 4  ;;  %s697_s5 = int_to_ptr.vmem [resolvable:$true] %s696_s5 }
  0x8d   : > { %s3559_s18 = scalar_lea.hbm %s4209_s7, %s3553_s2  ;;  %s2818_s20 = scalar_lea.hbm %s4209_s7, 32 }
  0x8e   : > { %s2813_s23 = scalar_lea.hbm %s3559_s18, 16  ;;  %p2819_p4 = scmp.lt.u32.totalorder %s3559_s18, %s4209_s7 }
  0x8f   : > { %p2814_p13 = scmp.ne.s32.totalorder %s3559_s18, %s2813_s23  ;;  %p2820_p6 = scmp.lt.u32.totalorder %s2818_s20, %s2813_s23 }
  0x90   : > { %p2822_p11 = scmp.lt.u32.totalorder %s2813_s23, %s3559_s18 }
  0x91   : > { %p2816_p2 = pnand %p2814_p13, %p3527_p8  ;;  %p2821_p7 = por %p2820_p6, %p2819_p4 }
  0x93   : > { %p2817_p10 = pneg %p2816_p2  ;;  %p2823_p12 = por %p2822_p11, %p2821_p7 }
  0x95   : > { %p2824_p1 = pnand %p2823_p12, %p2817_p10 }
  0x97   : > { %2827 = shalt.err (!%p2824_p1)
}
  0x98   : > { %s2828_s25 = scalar_lea.vmem %s697_s5, 16  ;;  %s3268_s28 = smov [#allocation12]  }
  0x99   : > { %p2829_p9 = scmp.ne.s32.totalorder %s697_s5, %s2828_s25  ;;  %s2833_s26 = sshll.u32 %s3268_s28, 4  ;;  %s2834_s26 = int_to_ptr.vmem [resolvable:$false] %s2833_s26 }
  0x9a   : > { %s2835_s30 = scalar_lea.vmem %s2834_s26, 32  ;;  %p2836_p13 = scmp.lt.s32.totalorder %s697_s5, %s2834_s26 }
  0x9b   : > { %p2831_p0 = pnand %p2829_p9, %p3527_p8  ;;  %p2837_p2 = scmp.lt.s32.totalorder %s2835_s30, %s2828_s25 }
  0x9d   : > { %p2832_p3 = pneg %p2831_p0  ;;  %p2838_p5 = por %p2837_p2, %p2836_p13 }
  0x9f   : > { %p2839_p4 = pnand %p2838_p5, %p2832_p3 }
  0xa1   : > { %2842 = shalt.err (!%p2839_p4)
}
  0xa2   : > { %p4210_p6 = scmp.ne.s32.totalorder %s4202_s1, 0  ;;  %s4211_s9 = sld [smem:[#allocation51_spill]] }
  0xa3   : > { %s723_s26 = scalar_lea.vmem [#allocation15], %s3511_s3  ;;  %s4168_s0 = scalar_lea.sflag [#allocation16], %s3508_s4 }
  0xa4   : > { %2591 = dma.hbm_to_vmem [thread:$0]  (!%p4210_p6), %s3559_s18, 16, %s697_s5, %s4167_s16  }
  0xa5   : > { %s730_s19 = sshll.u32 %s723_s26, 4  ;;  %s731_s19 = int_to_ptr.vmem [resolvable:$true] %s730_s19 }
  0xa8   : > { %s3586_s20 = scalar_lea.hbm %s4211_s9, %s3553_s2  ;;  %s2848_s18 = scalar_lea.hbm %s4211_s9, 32 }
  0xa9   : > { %s2843_s25 = scalar_lea.hbm %s3586_s20, 16  ;;  %p2849_p11 = scmp.lt.u32.totalorder %s3586_s20, %s4211_s9 }
  0xaa   : > { %p2844_p5 = scmp.ne.s32.totalorder %s3586_s20, %s2843_s25  ;;  %p2850_p12 = scmp.lt.u32.totalorder %s2848_s18, %s2843_s25 }
  0xab   : > { %p2852_p9 = scmp.lt.u32.totalorder %s2843_s25, %s3586_s20 }
  0xac   : > { %p2846_p10 = pnand %p2844_p5, %p3527_p8  ;;  %p2851_p1 = por %p2850_p12, %p2849_p11 }
  0xae   : > { %p2847_p7 = pneg %p2846_p10  ;;  %p2853_p0 = por %p2852_p9, %p2851_p1 }
  0xb0   : > { %p2854_p3 = pnand %p2853_p0, %p2847_p7 }
  0xb2   : > { %2857 = shalt.err (!%p2854_p3)
}
  0xb3   : > { %s2858_s27 = scalar_lea.vmem %s731_s19, 16  ;;  %s3269_s26 = smov [#allocation15]  }
  0xb4   : > { %p2859_p13 = scmp.ne.s32.totalorder %s731_s19, %s2858_s27  ;;  %s2863_s16 = sshll.u32 %s3269_s26, 4  ;;  %s2864_s16 = int_to_ptr.vmem [resolvable:$false] %s2863_s16 }
  0xb5   : > { %s2865_s28 = scalar_lea.vmem %s2864_s16, 32  ;;  %p2866_p5 = scmp.lt.s32.totalorder %s731_s19, %s2864_s16 }
  0xb6   : > { %p2861_p2 = pnand %p2859_p13, %p3527_p8  ;;  %p2867_p10 = scmp.lt.s32.totalorder %s2865_s28, %s2858_s27 }
  0xb8   : > { %p2862_p4 = pneg %p2861_p2  ;;  %p2868_p6 = por %p2867_p10, %p2866_p5 }
  0xba   : > { %p2869_p11 = pnand %p2868_p6, %p2862_p4 }
  0xbc   : > { %2872 = shalt.err (!%p2869_p11)
}
  0xbd   : > { %p4212_p12 = scmp.ne.s32.totalorder %s4202_s1, 0  ;;  %s4213_s11 = sld [smem:[#allocation52_spill]] }
  0xbe   : > { %s761_s16 = scalar_lea.vmem [#allocation18], %s3511_s3  ;;  %s4169_s23 = scalar_lea.sflag [#allocation19], %s3508_s4 }
  0xbf   : > { %2597 = dma.hbm_to_vmem [thread:$0]  (!%p4212_p12), %s3586_s20, 16, %s731_s19, %s4168_s0  }
  0xc0   : > { %s768_s30 = sshll.u32 %s761_s16, 4  ;;  %s769_s30 = int_to_ptr.vmem [resolvable:$true] %s768_s30 }
  0xc3   : > { %s3613_s18 = scalar_lea.hbm %s4213_s11, %s3553_s2  ;;  %s2878_s19 = scalar_lea.hbm %s4213_s11, 32 }
  0xc4   : > { %s2873_s27 = scalar_lea.hbm %s3613_s18, 16  ;;  %p2879_p9 = scmp.lt.u32.totalorder %s3613_s18, %s4213_s11 }
  0xc5   : > { %p2874_p6 = scmp.ne.s32.totalorder %s3613_s18, %s2873_s27  ;;  %p2880_p0 = scmp.lt.u32.totalorder %s2878_s19, %s2873_s27 }
  0xc6   : > { %p2882_p13 = scmp.lt.u32.totalorder %s2873_s27, %s3613_s18 }
  0xc7   : > { %p2876_p7 = pnand %p2874_p6, %p3527_p8  ;;  %p2881_p3 = por %p2880_p0, %p2879_p9 }
  0xc9   : > { %p2877_p1 = pneg %p2876_p7  ;;  %p2883_p2 = por %p2882_p13, %p2881_p3 }
  0xcb   : > { %p2884_p4 = pnand %p2883_p2, %p2877_p1 }
  0xcd   : > { %2887 = shalt.err (!%p2884_p4)
}
  0xce   : > { %s2888_s5 = scalar_lea.vmem %s769_s30, 16  ;;  %s3270_s16 = smov [#allocation18]  }
  0xcf   : > { %p2889_p5 = scmp.ne.s32.totalorder %s769_s30, %s2888_s5  ;;  %s2893_s0 = sshll.u32 %s3270_s16, 4  ;;  %s2894_s0 = int_to_ptr.vmem [resolvable:$false] %s2893_s0 }
  0xd0   : > { %s2895_s26 = scalar_lea.vmem %s2894_s0, 32  ;;  %p2896_p6 = scmp.lt.s32.totalorder %s769_s30, %s2894_s0 }
  0xd1   : > { %p2891_p10 = pnand %p2889_p5, %p3527_p8  ;;  %p2897_p7 = scmp.lt.s32.totalorder %s2895_s26, %s2888_s5 }
  0xd3   : > { %p2892_p11 = pneg %p2891_p10  ;;  %p2898_p12 = por %p2897_p7, %p2896_p6 }
  0xd5   : > { %p2899_p0 = pnand %p2898_p12, %p2892_p11 }
  0xd7   : > { %2902 = shalt.err (!%p2899_p0)
}
  0xd8   : > { %p4214_p9 = scmp.ne.s32.totalorder %s4202_s1, 0  ;;  %s4215_s14 = sld [smem:[#allocation54_spill]] }
  0xd9   : > { %s803_s0 = scalar_lea.vmem [#allocation21], %s3511_s3  ;;  %s3271_s25 = smov [#allocation3]  }
  0xda   : > { %2603 = dma.hbm_to_vmem [thread:$0]  (!%p4214_p9), %s3613_s18, 16, %s769_s30, %s4169_s23  }
  0xdb   : > { %s810_s28 = sshll.u32 %s803_s0, 4  ;;  %s3645_s5 = sshll.u32 %s3271_s25, 4  ;;  %s3643_s28 = int_to_ptr.vmem [resolvable:$true] %s810_s28  ;;  %s568_s5 = int_to_ptr.vmem [resolvable:$true] %s3645_s5 }
  0xdc   : > { %s4171_s16 = scalar_lea.sflag [#allocation22], %s3508_s4 }
  0xde   : > { %s3640_s19 = scalar_lea.hbm %s4215_s14, %s3553_s2  ;;  %s2908_s27 = scalar_lea.hbm %s4215_s14, 32 }
  0xdf   : > { %s2903_s26 = scalar_lea.hbm %s3640_s19, 16  ;;  %p2909_p13 = scmp.lt.u32.totalorder %s3640_s19, %s4215_s14 }
  0xe0   : > { %p2904_p12 = scmp.ne.s32.totalorder %s3640_s19, %s2903_s26  ;;  %p2910_p2 = scmp.lt.u32.totalorder %s2908_s27, %s2903_s26 }
  0xe1   : > { %p2912_p5 = scmp.lt.u32.totalorder %s2903_s26, %s3640_s19 }
  0xe2   : > { %p2906_p1 = pnand %p2904_p12, %p3527_p8  ;;  %p2911_p4 = por %p2910_p2, %p2909_p13 }
  0xe4   : > { %p2907_p3 = pneg %p2906_p1  ;;  %p2913_p10 = por %p2912_p5, %p2911_p4 }
  0xe6   : > { %p2914_p11 = pnand %p2913_p10, %p2907_p3 }
  0xe8   : > { %2917 = shalt.err (!%p2914_p11)
}
  0xe9   : > { %s2918_s0 = scalar_lea.vmem %s3643_s28, 16  ;;  %s3272_s25 = smov [#allocation21]  }
  0xea   : > { %p2919_p6 = scmp.ne.s32.totalorder %s3643_s28, %s2918_s0  ;;  %s2923_s18 = sshll.u32 %s3272_s25, 4  ;;  %s2924_s18 = int_to_ptr.vmem [resolvable:$false] %s2923_s18 }
  0xeb   : > { %s2925_s23 = scalar_lea.vmem %s2924_s18, 32  ;;  %p2926_p12 = scmp.lt.s32.totalorder %s3643_s28, %s2924_s18 }
  0xec   : > { %p2921_p7 = pnand %p2919_p6, %p3527_p8  ;;  %p2927_p1 = scmp.lt.s32.totalorder %s2925_s23, %s2918_s0 }
  0xee   : > { %p2922_p0 = pneg %p2921_p7  ;;  %p2928_p13 = por %p2927_p1, %p2926_p12 }
  0xf0   : > { %p2929_p2 = pnand %p2928_p13, %p2922_p0 }
  0xf2   : > { %2932 = shalt.err (!%p2929_p2)
}
  0xf3   : > { %2609 = dma.hbm_to_vmem [thread:$0]  (!%p4214_p9), %s3640_s19, 16, %s3643_s28, %s4171_s16  }
  0xf4   : > { %s4216_s27 = sld [smem:[#allocation44_spill]]  ;;  %p4217_p4 = scmp.ne.s32.totalorder %s4204_s12, 0 }
  0xfa   : > { %s2933_s20 = scalar_lea.hbm %s4216_s27, 256 }
  0xfb   : > { %p2934_p3 = scmp.ne.s32.totalorder %s4216_s27, %s2933_s20  ;;  %p2940_p11 = scmp.lt.u32.totalorder %s2933_s20, %s4216_s27 }
  0xfd   : > { %p2936_p5 = pnand %p2934_p3, %p4217_p4 }
  0xff   : > { %p2937_p10 = pneg %p2936_p5 }
 0x101   : > { %p2942_p6 = pnand %p2940_p11, %p2937_p10 }
 0x103   : > { %2945 = shalt.err (!%p2942_p6)
}
 0x104   : > { %s2946_s7 = scalar_lea.vmem %s568_s5, 256  ;;  %p2954_p1 = scmp.lt.s32.totalorder %s568_s5, %s568_s5 }
 0x105   : > { %p2947_p7 = scmp.ne.s32.totalorder %s568_s5, %s2946_s7  ;;  %p2955_p13 = scmp.lt.s32.totalorder %s2946_s7, %s2946_s7 }
 0x107   : > { %p2949_p0 = pnand %p2947_p7, %p4217_p4  ;;  %p2956_p2 = por %p2955_p13, %p2954_p1 }
 0x109   : > { %p2950_p12 = pneg %p2949_p0 }
 0x10b   : > { %p2957_p9 = pnand %p2956_p2, %p2950_p12 }
 0x10d   : > { %2960 = shalt.err (!%p2957_p9)
}
 0x10e   : > { %p4218_p3 = scmp.ne.s32.totalorder %s4201_s21, 0  ;;  %s4219_s19 = smov 8  }
 0x10f   : > { %s4220_s28 = smov 128   ;;  %s3273_s20 = smov [#allocation8]  }
 0x110   : > { %2569 = dma.hbm_to_vmem [thread:$0]  (!%p4218_p3), %s4216_s27, 256, %s568_s5, [#allocation4], %s4220_s28, %s4220_s28, %s4219_s19  }
 0x111   : > { %s595_s25 = sshll.u32 %s3273_s20, 4  ;;  %s3274_s18 = smov [#allocation26]   ;;  %s596_s25 = int_to_ptr.vmem [resolvable:$true] %s595_s25 }
 0x112   : > { %s619_s0 = sshll.u32 %s3274_s18, 4  ;;  %s4221_s16 = sld [smem:[#allocation47_spill]]  ;;  %s620_s0 = int_to_ptr.vmem [resolvable:$true] %s619_s0 }
 0x118   : > { %s2961_s9 = scalar_lea.hbm %s4221_s16, 16 }
 0x119   : > { %p2962_p9 = scmp.ne.s32.totalorder %s4221_s16, %s2961_s9  ;;  %p2968_p11 = scmp.lt.u32.totalorder %s2961_s9, %s4221_s16 }
 0x11b   : > { %p2964_p5 = pnand %p2962_p9, %p4217_p4 }
 0x11d   : > { %p2965_p10 = pneg %p2964_p5 }
 0x11f   : > { %p2970_p6 = pnand %p2968_p11, %p2965_p10 }
 0x121   : > { %2973 = shalt.err (!%p2970_p6)
}
 0x122   : > { %s2974_s5 = scalar_lea.vmem %s596_s25, 16  ;;  %s2981_s19 = scalar_lea.vmem %s596_s25, 32 }
 0x123   : > { %p2975_p7 = scmp.ne.s32.totalorder %s596_s25, %s2974_s5  ;;  %p2982_p1 = scmp.lt.s32.totalorder %s596_s25, %s596_s25 }
 0x124   : > { %p2983_p13 = scmp.lt.s32.totalorder %s2981_s19, %s2974_s5 }
 0x125   : > { %p2977_p0 = pnand %p2975_p7, %p4217_p4 }
 0x126   : > { %p2984_p2 = por %p2983_p13, %p2982_p1 }
 0x127   : > { %p2978_p12 = pneg %p2977_p0 }
 0x129   : > { %p2985_p8 = pnand %p2984_p2, %p2978_p12 }
 0x12b   : > { %2988 = shalt.err (!%p2985_p8)
}
 0x12c   : > { %2575 = dma.hbm_to_vmem [thread:$0]  (!%p4218_p3), %s4221_s16, 16, %s596_s25, [#allocation7]  }
 0x12d   : > { %s2305_s9 = sshll.u32 %s3511_s3, 4  ;;  %s2989_s30 = scalar_lea.hbm %s4135_s17, 16 }
 0x12e   : > { %p2990_p9 = scmp.ne.s32.totalorder %s4135_s17, %s2989_s30  ;;  %p2996_p10 = scmp.lt.u32.totalorder %s2989_s30, %s4135_s17 }
 0x130   : > { %p2992_p8 = pnand %p2990_p9, %p4217_p4 }
 0x132   : > { %p2993_p5 = pneg %p2992_p8 }
 0x134   : > { %p2998_p11 = pnand %p2996_p10, %p2993_p5 }
 0x136   : > { %3001 = shalt.err (!%p2998_p11)
}
 0x137   : > { %s3002_s25 = scalar_lea.vmem %s620_s0, 16  ;;  %s3009_s26 = scalar_lea.vmem %s620_s0, 32 }
 0x138   : > { %p3003_p6 = scmp.ne.s32.totalorder %s620_s0, %s3002_s25  ;;  %p3010_p12 = scmp.lt.s32.totalorder %s620_s0, %s620_s0 }
 0x139   : > { %p3011_p1 = scmp.lt.s32.totalorder %s3009_s26, %s3002_s25 }
 0x13a   : > { %p3005_p7 = pnand %p3003_p6, %p4217_p4 }
 0x13b   : > { %p3012_p13 = por %p3011_p1, %p3010_p12 }
 0x13c   : > { %p3006_p0 = pneg %p3005_p7 }
 0x13e   : > { %p3013_p2 = pnand %p3012_p13, %p3006_p0 }
 0x140   : > { %3016 = shalt.err (!%p3013_p2)
}
 0x141   : > { %2581 = dma.hbm_to_vmem [thread:$0]  (!%p4218_p3), %s4135_s17, 16, %s620_s0, [#allocation25]  }
 0x142   : > { %s2382_s11 = sshll.u32 %s3259_s24, 8  ;;  %s669_s21 = scalar_lea.vmem [#allocation11], %s2305_s9 }
 0x143   : > { %s3736_s29 = scalar_lea.hbm %s4124_s6, %s2382_s11  ;;  %s676_s28 = sshll.u32 %s669_s21, 4  ;;  %s3740_s28 = int_to_ptr.vmem [resolvable:$true] %s676_s28 }
 0x144   : > { %s3017_s30 = scalar_lea.hbm %s3736_s29, 256  ;;  %p4222_p9 = scmp.ne.s32.totalorder %s4208_s22, 0 }
 0x145   : > { %p3018_p4 = scmp.ne.s32.totalorder %s3736_s29, %s3017_s30  ;;  %s3022_s18 = scalar_lea.hbm %s4124_s6, 512 }
 0x146   : > { %p3023_p5 = scmp.lt.u32.totalorder %s3736_s29, %s4124_s6  ;;  %p3024_p10 = scmp.lt.u32.totalorder %s3022_s18, %s3017_s30 }
 0x147   : > { %p3020_p3 = pnand %p3018_p4, %p4222_p9  ;;  %p3026_p6 = scmp.lt.u32.totalorder %s3017_s30, %s3736_s29 }
 0x148   : > { %p3025_p11 = por %p3024_p10, %p3023_p5 }
 0x149   : > { %p3021_p8 = pneg %p3020_p3 }
 0x14a   : > { %p3027_p7 = por %p3026_p6, %p3025_p11 }
 0x14c   : > { %p3028_p0 = pnand %p3027_p7, %p3021_p8 }
 0x14e   : > { %3031 = shalt.err (!%p3028_p0)
}
 0x14f   : > { %s3032_s25 = scalar_lea.vmem %s3740_s28, 256  ;;  %s3275_s26 = smov [#allocation11]  }
 0x150   : > { %p3033_p12 = scmp.ne.s32.totalorder %s3740_s28, %s3032_s25  ;;  %s3037_s5 = sshll.u32 %s3275_s26, 4  ;;  %s3038_s5 = int_to_ptr.vmem [resolvable:$false] %s3037_s5 }
 0x151   : > { %s3039_s19 = scalar_lea.vmem %s3038_s5, 512  ;;  %p3040_p2 = scmp.lt.s32.totalorder %s3740_s28, %s3038_s5 }
 0x152   : > { %p3035_p1 = pnand %p3033_p12, %p4222_p9  ;;  %p3041_p4 = scmp.lt.s32.totalorder %s3039_s19, %s3032_s25 }
 0x154   : > { %p3036_p13 = pneg %p3035_p1  ;;  %p3042_p3 = por %p3041_p4, %p3040_p2 }
 0x156   : > { %p3043_p5 = pnand %p3042_p3, %p3036_p13 }
 0x158   : > { %3046 = shalt.err (!%p3043_p5)
}
 0x159   : > { %s3276_s12 = smov 64   ;;  %s3277_s14 = smov 4  }
 0x15a   : > { %p4223_p8 = scmp.ne.s32.totalorder %s4202_s1, 0  ;;  %s4224_s21 = scalar_lea.sflag [#allocation10], %s3508_s4 }
 0x15b   : > { %s3772_s20 = scalar_lea.hbm %s4126_s8, %s3553_s2  ;;  %s706_s18 = scalar_lea.vmem [#allocation14], %s3511_s3 }
 0x15c   : > { %2588 = dma.hbm_to_vmem [thread:$0]  (!%p4223_p8), %s3736_s29, 256, %s3740_s28, %s4224_s21, %s3276_s12, %s3276_s12, %s3277_s14  }
 0x15d   : > { %s713_s23 = sshll.u32 %s706_s18, 4  ;;  %s3047_s7 = scalar_lea.hbm %s3772_s20, 16  ;;  %s714_s23 = int_to_ptr.vmem [resolvable:$true] %s713_s23 }
 0x15e   : > { %p3048_p10 = scmp.ne.s32.totalorder %s3772_s20, %s3047_s7  ;;  %s3052_s29 = scalar_lea.hbm %s4126_s8, 32 }
 0x15f   : > { %p3053_p7 = scmp.lt.u32.totalorder %s3772_s20, %s4126_s8  ;;  %p3054_p0 = scmp.lt.u32.totalorder %s3052_s29, %s3047_s7 }
 0x160   : > { %p3050_p11 = pnand %p3048_p10, %p4222_p9  ;;  %p3056_p1 = scmp.lt.u32.totalorder %s3047_s7, %s3772_s20 }
 0x161   : > { %p3055_p12 = por %p3054_p0, %p3053_p7 }
 0x162   : > { %p3051_p6 = pneg %p3050_p11 }
 0x163   : > { %p3057_p13 = por %p3056_p1, %p3055_p12 }
 0x165   : > { %p3058_p2 = pnand %p3057_p13, %p3051_p6 }
 0x167   : > { %3061 = shalt.err (!%p3058_p2)
}
 0x168   : > { %s3062_s19 = scalar_lea.vmem %s714_s23, 16  ;;  %s3278_s21 = smov [#allocation14]  }
 0x169   : > { %p3063_p4 = scmp.ne.s32.totalorder %s714_s23, %s3062_s19  ;;  %s3067_s30 = sshll.u32 %s3278_s21, 4  ;;  %s3068_s30 = int_to_ptr.vmem [resolvable:$false] %s3067_s30 }
 0x16a   : > { %s3069_s0 = scalar_lea.vmem %s3068_s30, 32  ;;  %p3070_p10 = scmp.lt.s32.totalorder %s714_s23, %s3068_s30 }
 0x16b   : > { %p3065_p3 = pnand %p3063_p4, %p4222_p9  ;;  %p3071_p11 = scmp.lt.s32.totalorder %s3069_s0, %s3062_s19 }
 0x16d   : > { %p3066_p5 = pneg %p3065_p3  ;;  %p3072_p8 = por %p3071_p11, %p3070_p10 }
 0x16f   : > { %p3073_p0 = pnand %p3072_p8, %p3066_p5 }
 0x171   : > { %3076 = shalt.err (!%p3073_p0)
}
 0x172   : > { %p4225_p7 = scmp.ne.s32.totalorder %s4202_s1, 0  ;;  %s4226_s18 = scalar_lea.sflag [#allocation13], %s3508_s4 }
 0x173   : > { %s3799_s26 = scalar_lea.hbm %s4128_s10, %s2382_s11  ;;  %s741_s29 = scalar_lea.vmem [#allocation17], %s2305_s9 }
 0x174   : > { %2594 = dma.hbm_to_vmem [thread:$0]  (!%p4225_p7), %s3772_s20, 16, %s714_s23, %s4226_s18  }
 0x175   : > { %s748_s28 = sshll.u32 %s741_s29, 4  ;;  %s3077_s5 = scalar_lea.hbm %s3799_s26, 256  ;;  %s3803_s28 = int_to_ptr.vmem [resolvable:$true] %s748_s28 }
 0x176   : > { %p3078_p8 = scmp.ne.s32.totalorder %s3799_s26, %s3077_s5  ;;  %s3082_s23 = scalar_lea.hbm %s4128_s10, 512 }
 0x177   : > { %p3083_p1 = scmp.lt.u32.totalorder %s3799_s26, %s4128_s10  ;;  %p3084_p13 = scmp.lt.u32.totalorder %s3082_s23, %s3077_s5 }
 0x178   : > { %p3080_p6 = pnand %p3078_p8, %p4222_p9  ;;  %p3086_p4 = scmp.lt.u32.totalorder %s3077_s5, %s3799_s26 }
 0x179   : > { %p3085_p2 = por %p3084_p13, %p3083_p1 }
 0x17a   : > { %p3081_p12 = pneg %p3080_p6 }
 0x17b   : > { %p3087_p3 = por %p3086_p4, %p3085_p2 }
 0x17d   : > { %p3088_p5 = pnand %p3087_p3, %p3081_p12 }
 0x17f   : > { %3091 = shalt.err (!%p3088_p5)
}
 0x180   : > { %s3092_s9 = scalar_lea.vmem %s3803_s28, 256  ;;  %s3279_s21 = smov [#allocation17]  }
 0x181   : > { %p3093_p10 = scmp.ne.s32.totalorder %s3803_s28, %s3092_s9  ;;  %s3097_s30 = sshll.u32 %s3279_s21, 4  ;;  %s3098_s30 = int_to_ptr.vmem [resolvable:$false] %s3097_s30 }
 0x182   : > { %s3099_s0 = scalar_lea.vmem %s3098_s30, 512  ;;  %p3100_p8 = scmp.lt.s32.totalorder %s3803_s28, %s3098_s30 }
 0x183   : > { %p3095_p11 = pnand %p3093_p10, %p4222_p9  ;;  %p3101_p6 = scmp.lt.s32.totalorder %s3099_s0, %s3092_s9 }
 0x185   : > { %p3096_p0 = pneg %p3095_p11  ;;  %p3102_p1 = por %p3101_p6, %p3100_p8 }
 0x187   : > { %p3103_p13 = pnand %p3102_p1, %p3096_p0 }
 0x189   : > { %3106 = shalt.err (!%p3103_p13)
}
 0x18a   : > { %s4227_s18 = scalar_lea.sflag [#allocation16], %s3508_s4  ;;  %s3835_s29 = scalar_lea.hbm %s4131_s13, %s3553_s2 }
 0x18b   : > { %2600 = dma.hbm_to_vmem [thread:$0]  (!%p4225_p7), %s3799_s26, 256, %s3803_s28, %s4227_s18, %s3276_s12, %s3276_s12, %s3277_s14  }
 0x18c   : > { %s786_s5 = scalar_lea.vmem [#allocation20], %s3511_s3  ;;  %s3107_s20 = scalar_lea.hbm %s3835_s29, 16 }
 0x18d   : > { %s793_s24 = sshll.u32 %s786_s5, 4  ;;  %p3108_p12 = scmp.ne.s32.totalorder %s3835_s29, %s3107_s20  ;;  %s794_s24 = int_to_ptr.vmem [resolvable:$true] %s793_s24 }
 0x18e   : > { %s3112_s12 = scalar_lea.hbm %s4131_s13, 32  ;;  %p3113_p3 = scmp.lt.u32.totalorder %s3835_s29, %s4131_s13 }
 0x18f   : > { %p3110_p2 = pnand %p3108_p12, %p4222_p9  ;;  %p3114_p5 = scmp.lt.u32.totalorder %s3112_s12, %s3107_s20 }
 0x190   : > { %p3116_p11 = scmp.lt.u32.totalorder %s3107_s20, %s3835_s29 }
 0x191   : > { %p3111_p4 = pneg %p3110_p2  ;;  %p3115_p10 = por %p3114_p5, %p3113_p3 }
 0x193   : > { %p3117_p0 = por %p3116_p11, %p3115_p10 }
 0x195   : > { %p3118_p8 = pnand %p3117_p0, %p3111_p4 }
 0x197   : > { %3121 = shalt.err (!%p3118_p8)
}
 0x198   : > { %s3122_s28 = scalar_lea.vmem %s794_s24, 16  ;;  %s3280_s19 = smov [#allocation20]  }
 0x199   : > { %p3123_p6 = scmp.ne.s32.totalorder %s794_s24, %s3122_s28  ;;  %s3127_s9 = sshll.u32 %s3280_s19, 4  ;;  %s3128_s9 = int_to_ptr.vmem [resolvable:$false] %s3127_s9 }
 0x19a   : > { %s3129_s21 = scalar_lea.vmem %s3128_s9, 32  ;;  %p3130_p12 = scmp.lt.s32.totalorder %s794_s24, %s3128_s9 }
 0x19b   : > { %p3125_p1 = pnand %p3123_p6, %p4222_p9  ;;  %p3131_p2 = scmp.lt.s32.totalorder %s3129_s21, %s3122_s28 }
 0x19d   : > { %p3126_p13 = pneg %p3125_p1  ;;  %p3132_p7 = por %p3131_p2, %p3130_p12 }
 0x19f   : > { %p3133_p3 = pnand %p3132_p7, %p3126_p13 }
 0x1a1   : > { %3136 = shalt.err (!%p3133_p3)
}
 0x1a2   : > { %p4228_p5 = scmp.ne.s32.totalorder %s4202_s1, 0  ;;  %s4229_s30 = scalar_lea.sflag [#allocation19], %s3508_s4 }
 0x1a3   : > { %s3861_s7 = scalar_lea.hbm %s4133_s15, %s3553_s2  ;;  %s820_s25 = scalar_lea.vmem [#allocation23], %s3511_s3 }
 0x1a4   : > { %2606 = dma.hbm_to_vmem [thread:$0]  (!%p4228_p5), %s3835_s29, 16, %s794_s24, %s4229_s30  }
 0x1a5   : > { %s827_s5 = sshll.u32 %s820_s25, 4  ;;  %s3137_s20 = scalar_lea.hbm %s3861_s7, 16  ;;  %s828_s5 = int_to_ptr.vmem [resolvable:$true] %s827_s5 }
 0x1a6   : > { %p3138_p7 = scmp.ne.s32.totalorder %s3861_s7, %s3137_s20  ;;  %s3142_s29 = scalar_lea.hbm %s4133_s15, 32 }
 0x1a7   : > { %p3143_p11 = scmp.lt.u32.totalorder %s3861_s7, %s4133_s15  ;;  %p3144_p0 = scmp.lt.u32.totalorder %s3142_s29, %s3137_s20 }
 0x1a8   : > { %p3140_p4 = pnand %p3138_p7, %p4222_p9  ;;  %p3146_p6 = scmp.lt.u32.totalorder %s3137_s20, %s3861_s7 }
 0x1a9   : > { %p3145_p8 = por %p3144_p0, %p3143_p11 }
 0x1aa   : > { %p3141_p10 = pneg %p3140_p4 }
 0x1ab   : > { %p3147_p1 = por %p3146_p6, %p3145_p8 }
 0x1ad   : > { %p3148_p13 = pnand %p3147_p1, %p3141_p10 }
 0x1af   : > { %3151 = shalt.err (!%p3148_p13)
}
 0x1b0   : > { %s3152_s3 = scalar_lea.vmem %s828_s5, 16  ;;  %s3281_s2 = smov [#allocation23]  }
 0x1b1   : > { %p3153_p12 = scmp.ne.s32.totalorder %s828_s5, %s3152_s3  ;;  %s3157_s14 = sshll.u32 %s3281_s2, 4  ;;  %s3158_s14 = int_to_ptr.vmem [resolvable:$false] %s3157_s14 }
 0x1b2   : > { %s3159_s26 = scalar_lea.vmem %s3158_s14, 32  ;;  %p3160_p7 = scmp.lt.s32.totalorder %s828_s5, %s3158_s14 }
 0x1b3   : > { %p3155_p2 = pnand %p3153_p12, %p4222_p9  ;;  %p3161_p4 = scmp.lt.s32.totalorder %s3159_s26, %s3152_s3 }
 0x1b5   : > { %p3156_p3 = pneg %p3155_p2  ;;  %p3162_p5 = por %p3161_p4, %p3160_p7 }
 0x1b7   : > { %p3163_p0 = pnand %p3162_p5, %p3156_p3 }
 0x1b9   : > { %3166 = shalt.err (!%p3163_p0)
}
 0x1ba   : > { %p4230_p11 = scmp.ne.s32.totalorder %s4202_s1, 0  ;;  %s4231_s28 = scalar_lea.sflag [#allocation22], %s3508_s4 }
 0x1bb   : > { %s4232_s19 = sld [smem:[#allocation43_spill]] }
 0x1bc   : > { %2612 = dma.hbm_to_vmem [thread:$0]  (!%p4230_p11), %s3861_s7, 16, %s828_s5, %s4231_s28  }
 0x1c1   : > { %p4233_p10 = scmp.ne.s32.totalorder %s4232_s19, 0 }
 0x1c2   : > { %s4234_s22 = sld [smem:[#allocation39_spill]] (!%p4233_p10) }
 0x1c3   : > { %836 = sbr.rel (%p4233_p10) target bundleno = 3752 (0xea8), region = 100 }
 0x1c8   : > { %p4235_p9 = scmp.eq.s32.totalorder (!%p4233_p10), %s4234_s22, 0 }
 0x1ca   : > { %3210 = dma.done.wait (%p4235_p9), [#allocation4], 256   ;;  %p4236_p8 = pmov %p4235_p9 }
 0x1cc   : > { %3212 = vsyncadd (%p4236_p8), [#allocation4], 4294967040  ;;  %p4237_p6 = pmov %p4236_p8 }
 0x1ce   : > { %3214 = dma.done.wait (%p4237_p6), [#allocation7], 32   ;;  %p4238_p5 = pmov %p4237_p6 }
 0x1cf   : > { %s4239_s1 = sld [smem:[#allocation37_spill]]  ;;  %s4240_s4 = sld [smem:[#allocation42_spill]] }
 0x1d0   : > { %3216 = vsyncadd (%p4238_p5), [#allocation7], 4294967264  ;;  %s850_s9 = sand.u32 1, %s4234_s22  }
 0x1d1   : > { %s851_s0 = scalar_lea.sflag [#allocation10], %s850_s9 }
 0x1d5   : > { %s3895_s21 = sand.u32 1, %s4239_s1   ;;  %p4241_p1 = scmp.ne.s32.totalorder %s4240_s4, 0 }
 0x1d6   : > { %s2322_s30 = sshll.u32 %s3895_s21, 1 }
 0x1d7   : > { %s3898_s18 = scalar_lea.vmem [#allocation9], %s2322_s30 }
 0x1d8   : > { %3218 = dma.done.wait (%p4241_p1), %s851_s0, 288  }
 0x1d9   : > { %3220 = vsyncadd (%p4241_p1), %s851_s0, 4294967008  ;;  %s2323_s7 = sshll.u32 %s3895_s21, 4  ;;  %s869_s5 = scalar_lea.sflag [#allocation13], %s850_s9 }
 0x1da   : > { %s3905_s25 = scalar_lea.vmem [#allocation11], %s2323_s7  ;;  %s871_s20 = scalar_lea.vmem [#allocation12], %s3895_s21 }
 0x1db   : > { %3222 = dma.done.wait (%p4241_p1), %s869_s5, 32  }
 0x1dc   : > { %3224 = vsyncadd (%p4241_p1), %s869_s5, 4294967264  ;;  %s879_s23 = scalar_lea.vmem [#allocation14], %s3895_s21  ;;  %s885_s11 = scalar_lea.sflag [#allocation16], %s850_s9 }
 0x1dd   : > { %s887_s29 = scalar_lea.vmem [#allocation15], %s3895_s21 }
 0x1de   : > { %3226 = dma.done.wait (%p4241_p1), %s885_s11, 272  }
 0x1df   : > { %3228 = vsyncadd (%p4241_p1), %s885_s11, 4294967024  ;;  %s3918_s24 = scalar_lea.vmem [#allocation17], %s2323_s7  ;;  %s902_s12 = scalar_lea.sflag [#allocation19], %s850_s9 }
 0x1e0   : > { %s904_s3 = scalar_lea.vmem [#allocation18], %s3895_s21 }
 0x1e1   : > { %3230 = dma.done.wait (%p4241_p1), %s902_s12, 32  }
 0x1e2   : > { %3232 = vsyncadd (%p4241_p1), %s902_s12, 4294967264  ;;  %s912_s2 = scalar_lea.vmem [#allocation20], %s3895_s21  ;;  %s918_s14 = scalar_lea.sflag [#allocation22], %s850_s9 }
 0x1e3   : > { %s920_s26 = scalar_lea.vmem [#allocation21], %s3895_s21 }
 0x1e4   : > { %3234 = dma.done.wait (%p4241_p1), %s918_s14, 32  }
 0x1e5   : > { %3236 = vsyncadd (%p4241_p1), %s918_s14, 4294967264  ;;  %s928_s28 = scalar_lea.vmem [#allocation23], %s3895_s21  ;;  %p4242_p13 = pmov %p4238_p5 }
 0x1e6   : > { %p4243_p12 = pmov %p4238_p5 }
 0x1e7   : > { %3238 = dma.done.wait (%p4242_p13), [#allocation25], 528  }
 0x1e8   : > { %3240 = vsyncadd (%p4243_p12), [#allocation25], 4294966768  ;;  %p1036_p2 = scmp.lt.s32.totalorder %s4234_s22, 1  ;;  %s4244_s0 = sld [smem:[#allocation48_spill]] }
 0x1e9   : > { %s4245_s11 = sld [smem:[#allocation53_spill]]  ;;  %p4246_p3 = scmp.ne.s32.totalorder %s4234_s22, 0 }
 0x1ea   : > { %s1037_s19 = scalar_select %p1036_p2, %s4234_s22, 1 }
 0x1eb   : > { %1050 = sbr.rel (%p4246_p3) target bundleno = 810 (0x32a), region = 164  ;;  %v1051_v0 = vld [vmem:[#allocation3] sm:$0xff] (!%p4246_p3)  ;;  %vm1055_vm0 = vcmask (!%p4246_p3), 261120   ;;  %v1052_v1 = vld [vmem:[#allocation3 + $0x8] sm:$0xff] (!%p4246_p3)  ;;  %v2332_v21 = vld [vmem:[#allocation6] ss:$0 sm:$0xff] (!%p4246_p3) }
 0x1ec   : > { %s2384_s1 = sshll.u32 %s1037_s19, 5  ;;  %v1056_v2 = vsel (!%p4246_p3), %vm1055_vm0, %v1051_v0, 0.0  ;;  %v1059_v3 = vsel (!%p4246_p3), %vm1055_vm0, %v1052_v1, 0.0  ;;  %v2333_v23 = vld [vmem:[#allocation8] ss:$0 sm:$0xff] (!%p4246_p3) }
 0x1ed   : > { %1057 = vadd.xlane.f32.xlu0 (!%p4246_p3), %v1056_v2 }
 0x1ee   : > { %s3941_s7 = scalar_lea.vmem %s4244_s0, %s2384_s1 }
 0x1ef   : > { %s3946_s12 = scalar_lea.vmem %s4245_s11, %s2384_s1 }
 0x1f1   : > { %1060 = vadd.xlane.f32.xlu0 (!%p4246_p3), %v1059_v3 }
 0x27a   : > { %v1058_v4 = vpop.xlane.xlu0 %1057 }
 0x27b   : > { %v1063_v5 = vmul.f32 0.03125, %v1058_v4 }
 0x27d   : > { %v1065_v6 = vsub.f32 %v1051_v0, %v1063_v5 }
 0x27e   : > { %v1061_v7 = vpop.xlane.xlu0 %1060 }
 0x27f   : > { %v1064_v8 = vmul.f32 0.03125, %v1061_v7  ;;  %v1067_v9 = vmul.f32 %v1065_v6, %v1065_v6 }
 0x281   : > { %v1066_v10 = vsub.f32 %v1052_v1, %v1064_v8  ;;  %v1069_v11 = vsel %vm1055_vm0, %v1067_v9, 0.0 }
 0x282   : > { %1070 = vadd.xlane.f32.xlu1 %v1069_v11 }
 0x283   : > { %v1068_v12 = vmul.f32 %v1066_v10, %v1066_v10 }
 0x285   : > { %v1072_v13 = vsel %vm1055_vm0, %v1068_v12, 0.0 }
 0x286   : > { %1073 = vadd.xlane.f32.xlu1 %v1072_v13 }
 0x30f   : > { %v1071_v14 = vpop.xlane.xlu1 %1070 }
 0x310   : > { %v1075_v15 = vmul.f32 0.03125, %v1071_v14 }
 0x312   : > { %v1077_v16 = vadd.f32 1e-12, %v1075_v15 }
 0x313   : > { %v1074_v17 = vpop.xlane.xlu1 %1073 }
 0x314   : > { %2677 = vrsqrt.f32 %v1077_v16  ;;  %v1076_v18 = vmul.f32 0.03125, %v1074_v17 }
 0x316   : > { %v1078_v19 = vadd.f32 1e-12, %v1076_v18 }
 0x318   : > { %2679 = vrsqrt.f32 %v1078_v19 }
 0x31e   : > { %v2678_v20 = vpop.eup %2677 }
 0x31f   : > { %v1081_v22 = vmul.f32 %v2678_v20, %v1065_v6 }
 0x321   : > { %v1089_v24 = vmul.f32 %v2332_v21, %v1081_v22 }
 0x322   : > { %v2680_v25 = vpop.eup %2679 }
 0x323   : > { %v1097_v26 = vadd.f32 %v2333_v23, %v1089_v24  ;;  %v1082_v27 = vmul.f32 %v2680_v25, %v1066_v10 }
 0x325   : > { %1099 = vst.msk [vmem:[#allocation2] sm:$0xff] %vm1055_vm0, %v1097_v26  ;;  %v1090_v28 = vmul.f32 %v2332_v21, %v1082_v27 }
 0x327   : > { %v1098_v29 = vadd.f32 %v2333_v23, %v1090_v28 }
 0x329   : > { %1100 = vst.msk [vmem:[#allocation2 + $0x8] sm:$0xff] %vm1055_vm0, %v1098_v29 }
 0x32a PF: > { %v2681_v30 = vld [vmem:[%s3941_s7] sm:$0xff]   ;;  %v3282_v31 = vmov 0.0   ;;  %v2682_v32 = vld [vmem:[%s3941_s7 + $0x8] sm:$0xff]   ;;  %vm3283_vm1 = vmmov 0   ;;  %vm1127_vm2 = vcmask 261120   ;;  %v2683_v35 = vld [vmem:[%s3941_s7 + $0x10] sm:$0xff]  }
 0x32b   : > { %2422 = vmatprep.subr.bf16.mxu1 %v3282_v31  ;;  %2426 = vmatprep.mubr.msk.bf16.mxu1 %vm3283_vm1, %v3282_v31  ;;  %v2684_v37 = vld [vmem:[%s3941_s7 + $0x18] sm:$0xff]   ;;  %v2334_v38 = vld [vmem:[%s3898_s18] ss:$0 sm:$0xff]  ;;  %vm1246_vm3 = vcmask 130048   ;;  %s3284_s22 = smov 112   ;;  %s4247_s19 = sld [smem:[#allocation45_spill]] }
 0x32c   : > { %2423 = vmatpush3.bf16.msra.mxu1 %v2681_v30  ;;  %v3961_v33 = vld [vmem:[#allocation2] sm:$0xff]  ;;  %s3285_s5 = smov 96   ;;  %vm1718_vm4 = vcmask 523264  }
 0x32d   : > { %2424 = vmatprep.subr.bf16.mxu1 %v3282_v31  ;;  %v2343_v46 = vld [vmem:[%s3898_s18 + $0x1] ss:$0 sm:$0xff] }
 0x330   : > { %v3963_v34 = vld [vmem:[#allocation2 + $0x8] sm:$0xff]  ;;  %2425 = vmatpush3.bf16.msra.mxu1 %v2682_v32 }
 0x331   : > { %v1103_v36 = vpack.c.bf16 %v3963_v34, %v3961_v33  ;;  %2430 = vmatprep.subr.bf16.mxu1 %v3282_v31  ;;  %v1314_v59 = vld [vmem:[%s4247_s19 + $0x10] sm:$0xff]  ;;  %v1312_v62 = vld [vmem:[%s4247_s19] sm:$0xff]  ;;  %v1313_v3 = vld [vmem:[%s4247_s19 + $0x8] sm:$0xff] }
 0x332   : > { %v1315_v10 = vld [vmem:[%s4247_s19 + $0x18] sm:$0xff] }
 0x333   : > { %2427 = vmatmul.mubr.msk.bf16.vlgmr.msra.gmra.mrb[0].mxu1 %vm1127_vm2, %v1103_v36 }
 0x334   : > { %2431 = vmatpush3.bf16.msra.mxu1 %v2683_v35  ;;  %2434 = vmatprep.mubr.msk.bf16.mxu1 %vm3283_vm1, %v3282_v31 }
 0x335   : > { %2432 = vmatprep.subr.bf16.mxu1 %v3282_v31 }
 0x338   : > { %2433 = vmatpush3.bf16.msra.mxu1 %v2684_v37 }
 0x33b   : > { %2435 = vmatmul.mubr.msk.bf16.vlgmr.msra.gmra.mrb[4].mxu1 %vm1127_vm2, %v1103_v36 }
 0x406   : > { %v1165_v39 = vpop.f32.mrb[0].mxu1 }
 0x407   : > { %v2428_v40 = vpop.f32.mrb[1].mxu1  ;;  %v1166_v42 = vadd.f32 %v2334_v38, %v1165_v39 }
 0x408   : > { %v1168_v41 = vpop.f32.mrb[2].mxu1 }
 0x409   : > { %v1169_v43 = vadd.f32 %v2334_v38, %v1168_v41  ;;  %v2429_v44 = vpop.f32.mrb[3].mxu1 }
 0x40b   : > { %v3977_v45 = vpack.c.bf16 %v1169_v43, %v1166_v42 }
 0x40d   : > { %1242 = vrot.lane.b32.xlu0 %v3977_v45, %s3284_s22  ;;  %2442 = vmatprep.mubr.msk.bf16.mxu0 %vm1246_vm3, %v3977_v45 }
 0x40e   : > { %v1231_v47 = vpop.f32.mrb[4].mxu1 }
 0x40f   : > { %v2436_v48 = vpop.f32.mrb[5].mxu1  ;;  %v1232_v50 = vadd.f32 %v2343_v46, %v1231_v47 }
 0x410   : > { %v1234_v49 = vpop.f32.mrb[6].mxu1 }
 0x411   : > { %v1235_v51 = vadd.f32 %v2343_v46, %v1234_v49  ;;  %v2437_v52 = vpop.f32.mrb[7].mxu1 }
 0x412   : > { %v2685_v52 = vld [vmem:[%s3905_s25] sm:$0xff]  }
 0x413   : > { %v1239_v53 = vpack.c.bf16 %v1235_v51, %v1232_v50 }
 0x415   : > { %1244 = vrot.lane.b32.xlu0 %v1239_v53, %s3284_s22 }
 0x47f   : > { %v1243_v54 = vpop.permute.xlu0 %1242 }
 0x480   : > { %2520 = vmatprep.subr.msk.bf16.mxu0 %vm1246_vm3, %v1243_v54  ;;  %v1254_v55 = vsel %vm1246_vm3, %v1243_v54, 0  ;;  %v2686_v54 = vld [vmem:[%s3905_s25 + $0x8] sm:$0xff]   ;;  %s4248_s25 = sld [smem:[#allocation39_spill]] }
 0x481   : > { %2439 = vmatpush3.bf16.xpose.msra.mxu0 %v1254_v55 }
 0x486   : > { %p2372_p7 = scmp.ne.s32.totalorder %s4248_s25, 1 }
 0x487   : > { %v1245_v56 = vpop.permute.xlu0 %1244  ;;  %vm3287_vm5 = vmmov (!%p2372_p7), 0   ;;  %s4251_s18 = sld [smem:[#allocation57_spill]] (!%p2372_p7) }
 0x488   : > { %2521 = vmatprep.subr.msk.bf16.mxu0 %vm1246_vm3, %v1245_v56  ;;  %v1257_v57 = vsel %vm1246_vm3, %v1245_v56, 0 }
 0x489   : > { %2441 = vmatpush3.bf16.xpose.msra.mxu0 %v1257_v57 }
 0x48a   : > { %2460 = vmatprep.subr.bf16.mxu0 %v3282_v31 }
 0x490   : > { %2443 = vmatmul.mubr.msk.bf16.vlgmr.msra.gmra.mrb[0].mxu0 %vm1246_vm3, %v1239_v53 }
 0x491   : > { %2462 = vmatprep.mubr.msk.bf16.mxu0 %vm3283_vm1, %v3282_v31  ;;  %2461 = vmatpush3.bf16.msra.mxu0 %v2686_v54 }
 0x492   : > { %2474 = vmatprep.subr.bf16.mxu0 %v3282_v31 }
 0x563   : > { %v2444_v58 = vpop.f32.mrb[0].mxu0 }
 0x564   : > { %v1310_v60 = vmul.f32 0.25, %v2444_v58  ;;  %v1293_v61 = vpop.f32.mrb[1].mxu0 }
 0x565   : > { %v1308_v63 = vmul.f32 0.25, %v1293_v61  ;;  %v2445_v0 = vpop.f32.mrb[2].mxu0  ;;  %v2353_v61 = vld [vmem:[%s871_s20] ss:$0 sm:$0xff] }
 0x566   : > { %v1296_v1 = vpop.f32.mrb[3].mxu0  ;;  %v1318_v2 = vadd.f32 %v1314_v59, %v1310_v60  ;;  %v1311_v7 = vmul.f32 0.25, %v2445_v0 }
 0x567   : > { %v1309_v4 = vmul.f32 0.25, %v1296_v1  ;;  %v1316_v5 = vadd.f32 %v1312_v62, %v1308_v63 }
 0x568   : > { %v1326_v6 = vsel %vm1127_vm2, %v1318_v2, -inf  ;;  %v1319_v12 = vadd.f32 %v1315_v10, %v1311_v7 }
 0x569   : > { %1327 = vmax.xlane.f32.xlu0 %v1326_v6  ;;  %v1320_v8 = vsel %vm1127_vm2, %v1316_v5, -inf  ;;  %v1317_v9 = vadd.f32 %v1313_v3, %v1309_v4 }
 0x56a   : > { %1321 = vmax.xlane.f32.xlu1 %v1320_v8  ;;  %v1329_v13 = vsel %vm1127_vm2, %v1319_v12, -inf }
 0x56b   : > { %v1323_v11 = vsel %vm1127_vm2, %v1317_v9, -inf }
 0x56e   : > { %1324 = vmax.xlane.f32.xlu1 %v1323_v11 }
 0x572   : > { %1330 = vmax.xlane.f32.xlu1 %v1329_v13 }
 0x57f   : > { %1368 = vrot.lane.b32.xlu0 %v1239_v53, %s3285_s5 }
 0x5f6   : > { %v1328_v14 = vpop.xlane.xlu0 %1327 }
 0x5f7   : > { %v1334_v15 = vsub.f32 %v1318_v2, %v1328_v14  ;;  %v1322_v16 = vpop.xlane.xlu1 %1321 }
 0x5f8   : > { %v1332_v17 = vsub.f32 %v1316_v5, %v1322_v16 }
 0x5f9   : > { %v1340_v18 = vmul.f32 1.442695, %v1334_v15 }
 0x5fa   : > { %v1336_v19 = vmul.f32 1.442695, %v1332_v17  ;;  %v1369_v42 = vpop.permute.xlu0 %1368 }
 0x5fb   : > { %2693 = vpow2.f32 %v1340_v18  ;;  %v1325_v20 = vpop.xlane.xlu1 %1324 }
 0x5fc   : > { %2695 = vpow2.f32 %v1336_v19  ;;  %v1333_v21 = vsub.f32 %v1317_v9, %v1325_v20 }
 0x5fe   : > { %v1338_v24 = vmul.f32 1.442695, %v1333_v21 }
 0x5ff   : > { %v1331_v22 = vpop.xlane.xlu1 %1330 }
 0x600   : > { %v1335_v23 = vsub.f32 %v1319_v12, %v1331_v22 }
 0x602   : > { %v1342_v25 = vmul.f32 1.442695, %v1335_v23  ;;  %v2688_v23 = vld [vmem:[%s3918_s24 + $0x8] sm:$0xff]  }
 0x604   : > { %2697 = vpow2.f32 %v1342_v25 }
 0x605   : > { %v2694_v26 = vpop.eup %2693  ;;  %2699 = vpow2.f32 %v1338_v24 }
 0x606   : > { %v1350_v27 = vsel %vm1127_vm2, %v2694_v26, 0.0  ;;  %v2696_v28 = vpop.eup %2695 }
 0x607   : > { %1351 = vadd.xlane.f32.xlu1 %v1350_v27  ;;  %v1344_v29 = vsel %vm1127_vm2, %v2696_v28, 0.0 }
 0x60b   : > { %1345 = vadd.xlane.f32.xlu1 %v1344_v29 }
 0x60e   : > { %v2698_v30 = vpop.eup %2697 }
 0x60f   : > { %v1353_v32 = vsel %vm1127_vm2, %v2698_v30, 0.0  ;;  %v2700_v35 = vpop.eup %2699 }
 0x610   : > { %1354 = vadd.xlane.f32.xlu1 %v1353_v32  ;;  %v1347_v36 = vsel %vm1127_vm2, %v2700_v35, 0.0 }
 0x614   : > { %1348 = vadd.xlane.f32.xlu1 %v1347_v36 }
 0x625   : > { %1366 = vrot.lane.b32.xlu1 %v3977_v45, %s3285_s5 }
 0x694   : > { %v1352_v37 = vpop.xlane.xlu1 %1351 }
 0x698   : > { %v1346_v38 = vpop.xlane.xlu1 %1345 }
 0x69d   : > { %v1355_v39 = vpop.xlane.xlu1 %1354 }
 0x69e   : > { %2701 = vrcp.f32 %v1355_v39  ;;  %v2359_v39 = vld [vmem:[%s887_s29] ss:$0 sm:$0xff] }
 0x69f   : > { %2703 = vrcp.f32 %v1346_v38 }
 0x6a0   : > { %2705 = vrcp.f32 %v1352_v37 }
 0x6a1   : > { %v1349_v40 = vpop.xlane.xlu1 %1348 }
 0x6a2   : > { %2707 = vrcp.f32 %v1349_v40 }
 0x6a5   : > { %v1367_v41 = vpop.permute.xlu1 %1366 }
 0x6a6   : > { %2446 = vmatprep.subr.bf16.mxu1 %v1367_v41 }
 0x6a7   : > { %2447 = vmatpush3.bf16.msra.mxu1 %v1367_v41 }
 0x6a8   : > { %2448 = vmatprep.subr.bf16.mxu1 %v1369_v42  ;;  %v2702_v43 = vpop.eup %2701 }
 0x6a9   : > { %v2704_v44 = vpop.eup %2703  ;;  %v1363_v47 = vmul.f32 %v2702_v43, %v2698_v30 }
 0x6aa   : > { %v2706_v46 = vpop.eup %2705  ;;  %v1360_v48 = vmul.f32 %v2704_v44, %v2696_v28  ;;  %v2689_v44 = vld [vmem:[%s3946_s12] sm:$0xff]  }
 0x6ab   : > { %2449 = vmatpush3.bf16.msra.mxu1 %v1369_v42  ;;  %v1362_v50 = vmul.f32 %v2706_v46, %v2694_v26  ;;  %v2690_v46 = vld [vmem:[%s3946_s12 + $0x8] sm:$0xff]  }
 0x6ac   : > { %v2708_v45 = vpop.eup %2707  ;;  %2454 = vmatprep.subr.bf16.mxu1 %v3282_v31 }
 0x6ad   : > { %v1361_v49 = vmul.f32 %v2708_v45, %v2700_v35  ;;  %v1365_v53 = vpack.c.bf16 %v1363_v47, %v1362_v50  ;;  %v2358_v35 = vld [vmem:[%s879_s23] ss:$0 sm:$0xff]  ;;  %v2691_v45 = vld [vmem:[%s3946_s12 + $0x10] sm:$0xff]   ;;  %v2692_v47 = vld [vmem:[%s3946_s12 + $0x18] sm:$0xff]   ;;  %s4249_s23 = sld [smem:[#allocation56_spill]] (!%p2372_p7) }
 0x6af   : > { %v1364_v51 = vpack.c.bf16 %v1361_v49, %v1360_v48  ;;  %v2360_v48 = vld [vmem:[%s904_s3] ss:$0 sm:$0xff] }
 0x6b1   : > { %2450 = vmatprep.mubr.msk.bf16.mxu1 %vm1127_vm2, %v1364_v51 }
 0x6b2   : > { %2451 = vmatmul.mubr.msk.bf16.vlgmr.msra.gmra.mrb[8].mxu1 %vm1127_vm2, %v1365_v53 }
 0x6b3   : > { %2455 = vmatpush3.bf16.msra.mxu1 %v2685_v52  ;;  %2456 = vmatprep.mubr.msk.bf16.mxu1 %vm3283_vm1, %v3282_v31  ;;  %s4250_s29 = smov (!%p2372_p7), %s4249_s23 }
 0x6b4   : > { %2466 = vmatprep.subr.bf16.mxu1 %v3282_v31 }
 0x785   : > { %v2452_v55 = vpop.f32.mrb[8].mxu1 }
 0x786   : > { %v1412_v56 = vpop.f32.mrb[9].mxu1 }
 0x787   : > { %v2453_v57 = vpop.f32.mrb[10].mxu1 }
 0x788   : > { %v1489_v58 = vpack.c.bf16 %v2453_v57, %v2452_v55  ;;  %v1415_v59 = vpop.f32.mrb[11].mxu1 }
 0x789   : > { %v1428_v60 = vpack.c.bf16 %v1415_v59, %v1412_v56 }
 0x78a   : > { %2463 = vmatmul.mubr.msk.bf16.vlgmr.msra.gmra.mrb[4].mxu0 %vm1246_vm3, %v1489_v58 }
 0x78b   : > { %2457 = vmatmul.mubr.msk.bf16.vlgmr.msra.gmra.mrb[12].mxu1 %vm1246_vm3, %v1428_v60  ;;  %2482 = vmatprep.mubr.msk.bf16.mxu0 %vm3283_vm1, %v3282_v31 }
 0x78c   : > { %2470 = vmatprep.mubr.msk.bf16.mxu1 %vm3283_vm1, %v3282_v31  ;;  %2475 = vmatpush3.bf16.msra.mxu0 %v2689_v44 }
 0x78d   : > { %2476 = vmatprep.subr.bf16.mxu0 %v3282_v31 }
 0x790   : > { %2477 = vmatpush3.bf16.msra.mxu0 %v2690_v46 }
 0x791   : > { %2478 = vmatprep.subr.bf16.mxu0 %v3282_v31 }
 0x794   : > { %2479 = vmatpush3.bf16.msra.mxu0 %v2691_v45 }
 0x795   : > { %2480 = vmatprep.subr.bf16.mxu0 %v3282_v31 }
 0x798   : > { %2481 = vmatpush3.bf16.msra.mxu0 %v2692_v47  ;;  %v1816_v47 = vld [vmem:[#allocation24] sm:$0xff] (!%p2372_p7) }
 0x85d   : > { %v1536_v62 = vpop.f32.mrb[4].mxu0 }
 0x85e   : > { %v1474_v63 = vpop.f32.mrb[12].mxu1  ;;  %v2464_v0 = vpop.f32.mrb[5].mxu0 }
 0x85f   : > { %v1487_v1 = vadd.f32 %v2353_v61, %v1474_v63  ;;  %v2458_v2 = vpop.f32.mrb[13].mxu1  ;;  %v1539_v3 = vpop.f32.mrb[6].mxu0 }
 0x860   : > { %v1477_v4 = vpop.f32.mrb[14].mxu1  ;;  %v2465_v5 = vpop.f32.mrb[7].mxu0 }
 0x861   : > { %v1543_v6 = vadd.f32 %v1536_v62, %v1487_v1  ;;  %v1488_v7 = vadd.f32 %v2353_v61, %v1477_v4  ;;  %v2459_v8 = vpop.f32.mrb[15].mxu1 }
 0x863   : > { %v1544_v9 = vadd.f32 %v1539_v3, %v1488_v7  ;;  %v1545_v10 = vadd.f32 %v1543_v6, %v3961_v33 }
 0x865   : > { %v1549_v11 = vsel %vm1127_vm2, %v1545_v10, 0.0  ;;  %v1546_v12 = vadd.f32 %v1544_v9, %v3963_v34  ;;  %v2687_v34 = vld [vmem:[%s3918_s24] sm:$0xff]  }
 0x866   : > { %1550 = vadd.xlane.f32.xlu1 %v1549_v11  ;;  %2467 = vmatpush3.bf16.msra.mxu1 %v2687_v34  ;;  %v2364_v9 = vld [vmem:[%s912_s2] ss:$0 sm:$0xff] }
 0x867   : > { %v1552_v13 = vsel %vm1127_vm2, %v1546_v12, 0.0  ;;  %2468 = vmatprep.subr.bf16.mxu1 %v3282_v31 }
 0x868   : > { %1553 = vadd.xlane.f32.xlu0 %v1552_v13 }
 0x86a   : > { %2469 = vmatpush3.bf16.msra.mxu1 %v2688_v23 }
 0x8f3   : > { %v1551_v14 = vpop.xlane.xlu1 %1550 }
 0x8f4   : > { %v1556_v15 = vmul.f32 0.03125, %v1551_v14 }
 0x8f5   : > { %v1554_v16 = vpop.xlane.xlu0 %1553 }
 0x8f6   : > { %v1558_v17 = vsub.f32 %v1545_v10, %v1556_v15  ;;  %v1557_v18 = vmul.f32 0.03125, %v1554_v16 }
 0x8f8   : > { %v1559_v19 = vsub.f32 %v1546_v12, %v1557_v18  ;;  %v1560_v20 = vmul.f32 %v1558_v17, %v1558_v17 }
 0x8fa   : > { %v1562_v21 = vsel %vm1127_vm2, %v1560_v20, 0.0  ;;  %v1561_v33 = vmul.f32 %v1559_v19, %v1559_v19 }
 0x8fb   : > { %1563 = vadd.xlane.f32.xlu1 %v1562_v21 }
 0x8fc   : > { %v1565_v22 = vsel %vm1127_vm2, %v1561_v33, 0.0 }
 0x8ff   : > { %1566 = vadd.xlane.f32.xlu1 %v1565_v22 }
 0x988   : > { %v1564_v24 = vpop.xlane.xlu1 %1563 }
 0x989   : > { %v1568_v25 = vmul.f32 0.03125, %v1564_v24 }
 0x98b   : > { %v1570_v26 = vadd.f32 1e-12, %v1568_v25 }
 0x98c   : > { %v1567_v27 = vpop.xlane.xlu1 %1566 }
 0x98d   : > { %2709 = vrsqrt.f32 %v1570_v26  ;;  %v1569_v28 = vmul.f32 0.03125, %v1567_v27 }
 0x98f   : > { %v1571_v29 = vadd.f32 1e-12, %v1569_v28 }
 0x991   : > { %2711 = vrsqrt.f32 %v1571_v29 }
 0x997   : > { %v2710_v30 = vpop.eup %2709 }
 0x998   : > { %v1574_v32 = vmul.f32 %v2710_v30, %v1558_v17 }
 0x99a   : > { %v1582_v37 = vmul.f32 %v2358_v35, %v1574_v32 }
 0x99b   : > { %v2712_v36 = vpop.eup %2711 }
 0x99c   : > { %v1575_v38 = vmul.f32 %v2712_v36, %v1559_v19  ;;  %v1590_v41 = vadd.f32 %v2359_v39, %v1582_v37 }
 0x99e   : > { %v1583_v40 = vmul.f32 %v2358_v35, %v1575_v38  ;;  %v2370_v38 = vld [vmem:[%s920_s26] ss:$0 sm:$0xff] }
 0x9a0   : > { %v1591_v42 = vadd.f32 %v2359_v39, %v1583_v40 }
 0x9a2   : > { %v1592_v43 = vpack.c.bf16 %v1591_v42, %v1590_v41 }
 0x9a4   : > { %2471 = vmatmul.mubr.msk.bf16.vlgmr.msra.gmra.mrb[16].mxu1 %vm1127_vm2, %v1592_v43 }
 0xa77   : > { %v1653_v49 = vpop.f32.mrb[16].mxu1 }
 0xa78   : > { %v1654_v50 = vadd.f32 %v2360_v48, %v1653_v49  ;;  %v2472_v51 = vpop.f32.mrb[17].mxu1  ;;  %v1818_v49 = vld [vmem:[#allocation24 + $0x10] sm:$0xff] (!%p2372_p7) }
 0xa79   : > { %v1656_v52 = vpop.f32.mrb[18].mxu1 }
 0xa7a   : > { %v1662_v53 = vmul.f32 0.044715, %v1654_v50  ;;  %v1657_v54 = vadd.f32 %v2360_v48, %v1656_v52  ;;  %v2473_v55 = vpop.f32.mrb[19].mxu1  ;;  %v1660_v3 = vmul.f32 0.5, %v1654_v50  ;;  %v1817_v48 = vld [vmem:[#allocation24 + $0x8] sm:$0xff] (!%p2372_p7)  ;;  %v1819_v52 = vld [vmem:[#allocation24 + $0x18] sm:$0xff] (!%p2372_p7) }
 0xa7b   : > { %v2509_v51 = vpack.c.bf16 (!%p2372_p7), %v1817_v48, %v1816_v47 }
 0xa7c   : > { %v1664_v56 = vmul.f32 %v1662_v53, %v1654_v50  ;;  %v1663_v57 = vmul.f32 0.044715, %v1657_v54  ;;  %v1661_v4 = vmul.f32 0.5, %v1657_v54  ;;  %v3288_v53 = vmov (!%p2372_p7), 0.0  }
 0xa7d   : > { %2505 = vmatprep.mubr.msk.f32.mxu1 (!%p2372_p7), %vm3287_vm5, %v3288_v53 }
 0xa7e   : > { %v1666_v58 = vmul.f32 %v1664_v56, %v1654_v50  ;;  %v1665_v59 = vmul.f32 %v1663_v57, %v1657_v54  ;;  %v1901_v56 = vld [vmem:[%s4249_s23] sm:$0xff] (!%p2372_p7)  ;;  %v1902_v57 = vld [vmem:[%s4250_s29 + $0x8] sm:$0xff] (!%p2372_p7) }
 0xa80   : > { %v1668_v60 = vadd.f32 %v1666_v58, %v1654_v50  ;;  %v1667_v61 = vmul.f32 %v1665_v59, %v1657_v54  ;;  %v3286_v50 = vmov (!%p2372_p7), 0.0|0.0   ;;  %v1903_v58 = vld [vmem:[%s4250_s29 + $0x10] sm:$0xff] (!%p2372_p7)  ;;  %v2515_v59 = vpack.c.bf16 (!%p2372_p7), %v1902_v57, %v1901_v56 }
 0xa81   : > { %2508 = vmatprep.subr.bf16.mxu0 (!%p2372_p7), %v3286_v50  ;;  %2514 = vmatprep.subr.bf16.mxu1 (!%p2372_p7), %v3286_v50 }
 0xa82   : > { %v1670_v62 = vmul.f32 0.7978846, %v1668_v60  ;;  %v1669_v63 = vadd.f32 %v1667_v61, %v1657_v54  ;;  %v2512_v54 = vpack.c.bf16 (!%p2372_p7), %v1819_v52, %v1818_v49  ;;  %v1904_v60 = vld [vmem:[%s4250_s29 + $0x18] sm:$0xff] (!%p2372_p7)  ;;  %2516 = vmatpush3.bf16.msra.mxu1 (!%p2372_p7), %v2515_v59 }
 0xa83   : > { %v2518_v61 = vpack.c.bf16 (!%p2372_p7), %v1904_v60, %v1903_v58  ;;  %2517 = vmatprep.subr.bf16.mxu1 (!%p2372_p7), %v3286_v50 }
 0xa84   : > { %2713 = vtanh.f32 %v1670_v62  ;;  %v1671_v31 = vmul.f32 0.7978846, %v1669_v63  ;;  %v2373_v62 = vld [vmem:[#allocation26] ss:$0 sm:$0xff] (!%p2372_p7) }
 0xa86   : > { %2715 = vtanh.f32 %v1671_v31  ;;  %2519 = vmatpush3.bf16.msra.mxu1 (!%p2372_p7), %v2518_v61 }
 0xa8e   : > { %v2714_v0 = vpop.eup %2713 }
 0xa8f   : > { %v1674_v1 = vadd.f32 1.0, %v2714_v0 }
 0xa90   : > { %v2716_v2 = vpop.eup %2715 }
 0xa91   : > { %v1675_v5 = vadd.f32 1.0, %v2716_v2  ;;  %v1676_v6 = vmul.f32 %v1674_v1, %v1660_v3  ;;  %v2375_v2 = vld [vmem:[%s4251_s18] ss:$0 sm:$0xff] (!%p2372_p7) }
 0xa93   : > { %v1677_v7 = vmul.f32 %v1675_v5, %v1661_v4 }
 0xa95   : > { %v1678_v8 = vpack.c.bf16 %v1677_v7, %v1676_v6 }
 0xa97   : > { %2483 = vmatmul.mubr.msk.bf16.vlgmr.msra.gmra.mrb[8].mxu0 %vm1718_vm4, %v1678_v8 }
 0xa98   : > { %2494 = vmatprep.mubr.msk.f32.mxu0 (!%p2372_p7), %vm3287_vm5, %v3288_v53  ;;  %2510 = vmatpush3.bf16.msra.mxu0 (!%p2372_p7), %v2509_v51 }
 0xa99   : > { %2511 = vmatprep.subr.bf16.mxu0 (!%p2372_p7), %v3286_v50 }
 0xa9c   : > { %2513 = vmatpush3.bf16.msra.mxu0 (!%p2372_p7), %v2512_v54 }
 0xb6a   : > { %v1756_v10 = vpop.f32.mrb[8].mxu0 }
 0xb6b   : > { %v1757_v11 = vadd.f32 %v2364_v9, %v1756_v10  ;;  %v2484_v12 = vpop.f32.mrb[9].mxu0 }
 0xb6c   : > { %v1759_v13 = vpop.f32.mrb[10].mxu0 }
 0xb6d   : > { %v1760_v14 = vadd.f32 %v2364_v9, %v1759_v13  ;;  %v2485_v15 = vpop.f32.mrb[11].mxu0  ;;  %v1763_v16 = vadd.f32 %v1757_v11, %v1590_v41  ;;  %v2371_v41 = vld [vmem:[%s928_s28] ss:$0 sm:$0xff] }
 0xb6f   : > { %v1767_v17 = vsel %vm1127_vm2, %v1763_v16, 0.0  ;;  %v1764_v18 = vadd.f32 %v1760_v14, %v1591_v42 }
 0xb70   : > { %1768 = vadd.xlane.f32.xlu1 %v1767_v17 }
 0xb71   : > { %v1770_v19 = vsel %vm1127_vm2, %v1764_v18, 0.0 }
 0xb72   : > { %1771 = vadd.xlane.f32.xlu0 %v1770_v19 }
 0xbfd   : > { %v1769_v20 = vpop.xlane.xlu1 %1768 }
 0xbfe   : > { %v1773_v21 = vmul.f32 0.03125, %v1769_v20 }
 0xbff   : > { %v1772_v33 = vpop.xlane.xlu0 %1771 }
 0xc00   : > { %v1775_v22 = vsub.f32 %v1763_v16, %v1773_v21  ;;  %v1774_v34 = vmul.f32 0.03125, %v1772_v33 }
 0xc02   : > { %v1776_v23 = vsub.f32 %v1764_v18, %v1774_v34  ;;  %v1777_v24 = vmul.f32 %v1775_v22, %v1775_v22 }
 0xc04   : > { %v1779_v25 = vsel %vm1127_vm2, %v1777_v24, 0.0  ;;  %v1778_v26 = vmul.f32 %v1776_v23, %v1776_v23 }
 0xc05   : > { %1780 = vadd.xlane.f32.xlu1 %v1779_v25 }
 0xc06   : > { %v1782_v27 = vsel %vm1127_vm2, %v1778_v26, 0.0 }
 0xc07   : > { %1783 = vadd.xlane.f32.xlu0 %v1782_v27 }
 0xc92   : > { %v1781_v28 = vpop.xlane.xlu1 %1780 }
 0xc93   : > { %v1785_v29 = vmul.f32 0.03125, %v1781_v28 }
 0xc94   : > { %v1784_v30 = vpop.xlane.xlu0 %1783 }
 0xc95   : > { %v1787_v32 = vadd.f32 1e-12, %v1785_v29  ;;  %v1786_v35 = vmul.f32 0.03125, %v1784_v30 }
 0xc97   : > { %2717 = vrsqrt.f32 %v1787_v32  ;;  %v1788_v36 = vadd.f32 1e-12, %v1786_v35 }
 0xc99   : > { %2719 = vrsqrt.f32 %v1788_v36 }
 0xca1   : > { %v2718_v37 = vpop.eup %2717 }
 0xca2   : > { %v1791_v39 = vmul.f32 %v2718_v37, %v1775_v22 }
 0xca3   : > { %v2720_v40 = vpop.eup %2719 }
 0xca4   : > { %v1799_v42 = vmul.f32 %v2370_v38, %v1791_v39  ;;  %v1792_v43 = vmul.f32 %v2720_v40, %v1776_v23  ;;  %1814 = sbr.rel (%p2372_p7) target bundleno = 3718 (0xe86), region = 168 }
 0xca6   : > { %v1807_v44 = vadd.f32 %v2371_v41, %v1799_v42  ;;  %v1800_v46 = vmul.f32 %v2370_v38, %v1792_v43 }
 0xca8   : > { %1809 = vst.msk [vmem:[#allocation2] sm:$0xff] %vm1127_vm2, %v1807_v44  ;;  %v1808_v45 = vadd.f32 %v2371_v41, %v1800_v46 }
 0xcaa   : > { %1810 = vst.msk [vmem:[#allocation2 + $0x8] sm:$0xff] %vm1127_vm2, %v1808_v45 }
 0xcb1   : > { %v1815_v55 = vld [vmem:[#allocation2] ss:$8 sm:$0x3] }
 0xcb2   : > { %2495 = vmatmul.mubr.msk.f32.vlgmr.msra.gmra.mrb[0].mxu0 %vm1127_vm2, %v1815_v55 }
 0xd85   : > { %v1896_v63 = vpop.f32.mrb[0].mxu0 }
 0xd86   : > { %v1897_v31 = vadd.f32 %v2373_v62, %v1896_v63  ;;  %v2496_v0 = vpop.f32.mrb[1].mxu0 }
 0xd88   : > { %2721 = vtanh.f32 %v1897_v31 }
 0xd92   : > { %v2722_v1 = vpop.eup %2721 }
 0xd93   : > { %2506 = vmatmul.mubr.msk.f32.vlgmr.msra.gmra.mrb[0].mxu1 %vm1127_vm2, %v2722_v1 }
 0xe66   : > { %v1981_v3 = vpop.f32.mrb[0].mxu1 }
 0xe67   : > { %v1982_v4 = vadd.f32 %v2375_v2, %v1981_v3  ;;  %v2507_v5 = vpop.f32.mrb[1].mxu1 }
 0xe69   : > { %v1985_v6 = vsub.f32 0.0, %v1982_v4 }
 0xe6b   : > { %v1986_v7 = vmul.f32 1.442695, %v1985_v6 }
 0xe6d   : > { %2723 = vpow2.f32 %v1986_v7 }
 0xe77   : > { %v2724_v8 = vpop.eup %2723 }
 0xe78   : > { %v1988_v9 = vadd.f32 1.0, %v2724_v8 }
 0xe7a   : > { %2725 = vrcp.f32 %v1988_v9 }
 0xe84   : > { %v2726_v10 = vpop.eup %2725 }
 0xe85   : > { %1991 = vst [vmem:[#allocation27] sm:$0x3] %v2726_v10 }
 0xe86 PF: > { %s4252_s14 = sld [smem:[#allocation39_spill]]  ;;  %s3289_s1 = smov [#allocation27]  }
 0xe87   : > { %s1999_s9 = sshll.u32 %s3289_s1, 4  ;;  %s2000_s9 = int_to_ptr.vmem [resolvable:$true] %s1999_s9 }
 0xe88   : > { %s3167_s30 = scalar_lea.vmem %s2000_s9, 32  ;;  %p3174_p9 = scmp.lt.s32.totalorder %s2000_s9, %s2000_s9 }
 0xe89   : > { %p3168_p0 = scmp.ne.s32.totalorder %s2000_s9, %s3167_s30  ;;  %p3175_p8 = scmp.lt.s32.totalorder %s3167_s30, %s3167_s30 }
 0xe8b   : > { %p3176_p6 = por %p3175_p8, %p3174_p9 }
 0xe8c   : > { %p2624_p4 = scmp.eq.s32.totalorder %s4252_s14, 1 }
 0xe8e   : > { %p3169_p11 = pnand %p3168_p0, %p2624_p4 }
 0xe90   : > { %p3170_p10 = pneg %p3169_p11 }
 0xe92   : > { %p3177_p5 = pnand %p3176_p6, %p3170_p10 }
 0xe94   : > { %3180 = shalt.err (!%p3177_p5)
}
 0xe95   : > { %s4253_s4 = sld [smem:[#allocation58_spill]] }
 0xe9b   : > { %s3181_s5 = scalar_lea.hbm %s4253_s4, 32 }
 0xe9c   : > { %p3182_p1 = scmp.ne.s32.totalorder %s4253_s4, %s3181_s5  ;;  %p3187_p2 = scmp.lt.u32.totalorder %s3181_s5, %s4253_s4 }
 0xe9e   : > { %p3183_p13 = pnand %p3182_p1, %p2624_p4 }
 0xea0   : > { %p3184_p12 = pneg %p3183_p13 }
 0xea2   : > { %p3189_p3 = pnand %p3187_p2, %p3184_p12 }
 0xea4   : > { %3192 = shalt.err (!%p3189_p3)
}
 0xea5   : > { %2563 = dma.vmem_to_hbm [thread:$0]  (%p2624_p4), %s2000_s9, 32, %s4253_s4, [#allocation5]  }
 0xea6   : > { %3242 = dma.done.wait (%p2624_p4), [#allocation5], 32  }
 0xea7   : > { %3244 = vsyncadd (%p2624_p4), [#allocation5], 4294967264 }
 0xea8 PF: > { %s4254_s24 = sld [smem:[#allocation40_spill]]  ;;  %s4255_s1 = sld [smem:[#allocation37_spill]] }
 0xea9   : > { %s4256_s22 = sld [smem:[#allocation38_spill]]  ;;  %s4257_s23 = sld [smem:[#allocation41_spill]] }
 0xeae   : > { %p46_p7 = scmp.ge.s32.totalorder %s4254_s24, 4  }
 0xeb0   :  { %48 = sbr.rel (!%p46_p7) target bundleno = 31 (0x1f), region = 282 }
 0xeb7   :  { %2012 = vsyncpa [#allocation4], 1 }
 0xeb8   :  { %2014 = vsyncpa [#allocation4 + $0x1], 1 }
 0xeb9   :  { %2015 = vsyncpa [#allocation7], 1 }
 0xeba   :  { %2016 = vsyncpa [#allocation10], 1 }
 0xebb   :  { %2018 = vsyncpa [#allocation10 + $0x1], 1 }
 0xebc   :  { %2019 = vsyncpa [#allocation13], 1 }
 0xebd   :  { %2021 = vsyncpa [#allocation13 + $0x1], 1 }
 0xebe   :  { %2022 = vsyncpa [#allocation16], 1 }
 0xebf   :  { %2024 = vsyncpa [#allocation16 + $0x1], 1 }
 0xec0   :  { %2025 = vsyncpa [#allocation19], 1 }
 0xec1   :  { %2027 = vsyncpa [#allocation19 + $0x1], 1 }
 0xec2   :  { %2028 = vsyncpa [#allocation22], 1 }
 0xec3   :  { %2030 = vsyncpa [#allocation22 + $0x1], 1 }
 0xec4   :  { %2031 = vsyncpa [#allocation25], 1 }
 0xec5   :  { %2032 = vsyncpa [#allocation5], 1 }
 0xec6   :  { %2034 = vsyncpa [#allocation5 + $0x1], 1 }

</bundles_post_ra>
